<compile_context>
chip_gen: v6e
topology: v6e:2x2x1
jax: 0.10.0
libtpu: 0.0.40
codegen_flags: <defaults>
</compile_context>

<pallas_src>
import jax
import jax.numpy as jnp
from jax import lax
from jax.experimental import pallas as pl
from jax.experimental.pallas import tpu as pltpu

EPS = 1e-5


def _round_up(x, m):
    return ((x + m - 1) // m) * m


# ----------------------------- Pallas kernel ------------------------------

def _make_double_conv_kernel(*, Wp, lead, off, Qp, Tp, Cin_p, Cout_p, inv_count):
    """Fused DoubleConv2d kernel for static geometry.

    Wp      : padded row length (W + 2)
    lead    : zero lanes prepended so that `off` is 128-aligned
    off     : slab position of the first interior output pixel (off % 128 == 0)
    Qp      : output-window length (multiple of 256)
    Tp      : total slab lane width
    Cin_p   : padded input channels  (multiple of 8)
    Cout_p  : padded output channels (multiple of 8)
    inv_count: 1 / (N*H*W) for the BatchNorm statistics
    """
    # tap k = kh*3 + kw reads the slab window starting at `shifts[k]`
    shifts = [lead + kh * Wp + kw for kh in range(3) for kw in range(3)]
    tail = Tp - (off + Qp)

    def kernel(x_ref, w1_ref, w2_ref, g1_ref, b1_ref, g2_ref, b2_ref,
               mask_ref, o_ref, y1_ref, stack_ref):
        mask = mask_ref[...]                                   # (1, Qp) f32

        def conv3x3(src_ref, w_ref, c):
            # Stack the 9 shifted slices on the contraction axis, then one
            # MXU matmul with K = 9*c (instead of 9 tiny dots + 9 VPU adds).
            for k, s in enumerate(shifts):
                stack_ref[k * c:(k + 1) * c, :] = src_ref[:, s:s + Qp]
            return jnp.dot(w_ref[...], stack_ref[:9 * c, :],
                           preferred_element_type=jnp.float32)

        def bn_relu(y, g_ref, b_ref):
            # Training-mode BatchNorm (biased variance) folded to scale/shift.
            # TODO(synk): once the lane axis is gridded, compute the mask
            # in-kernel via broadcasted_iota and do these two lane reductions
            # as a (Cout,Qp)@(Qp,1) matmul against the mask column (MXU).
            ym = y * mask
            mean = jnp.sum(ym, axis=1, keepdims=True) * inv_count
            var = jnp.maximum(
                jnp.sum(ym * ym, axis=1, keepdims=True) * inv_count - mean * mean,
                0.0)
            scale = g_ref[...] * lax.rsqrt(var + EPS)
            shift = b_ref[...] - mean * scale
            return jnp.maximum(y * scale + shift, 0.0)

        # ---- conv1 + BN1 + ReLU: result becomes conv2's zero-padded input ----
        y1 = bn_relu(conv3x3(x_ref, w1_ref, Cin_p), g1_ref, b1_ref) * mask
        # Zero only the (128-aligned) halo column bands of the y1 slab.
        y1_ref[:, :off] = jnp.zeros((Cout_p, off), jnp.bfloat16)
        if tail > 0:
            y1_ref[:, off + Qp:] = jnp.zeros((Cout_p, tail), jnp.bfloat16)
        # Lane-aligned unmasked store of the interior window (off % 128 == 0).
        y1_ref[:, off:off + Qp] = y1.astype(jnp.bfloat16)

        # ---- conv2 + BN2 + ReLU: write the full bf16 output window ----
        # Junk lanes hold finite (meaningless) values; the wrapper slices
        # them away, so no final mask multiply / zero-init is needed.
        y2 = bn_relu(conv3x3(y1_ref, w2_ref, Cout_p), g2_ref, b2_ref)
        o_ref[...] = y2.astype(jnp.bfloat16)

    return kernel


# ------------------------------ wrapper ------------------------------------

def double_conv2d_forward(x_nchw, params):
    w1, g1, b1 = params["w1"], params["g1"], params["b1"]
    w2, g2, b2 = params["w2"], params["g2"], params["b2"]

    N, Cin, H, W = x_nchw.shape
    Cout = w1.shape[0]
    Cin_p, Cout_p = _round_up(Cin, 8), _round_up(Cout, 8)
    Hp, Wp = H + 2, W + 2
    P, T = Hp * Wp, N * Hp * Wp

    # Lane geometry: lead zeros so the interior-window origin is 128-aligned,
    # Qp a multiple of 256 (full MXU lane panels on v6e/v7x).
    lead = (-(Wp + 1)) % 128
    off = lead + Wp + 1                       # off % 128 == 0
    Qp = _round_up(T - 2 * Wp - 2, 256)       # output-window length
    Tp = _round_up(lead + 2 * Wp + 2 + Qp, 128)

    # Channels-first, zero-padded, flattened lane-dense slab: (Cin_p, Tp).
    xp = jnp.pad(jnp.transpose(x_nchw, (1, 0, 2, 3)),
                 ((0, Cin_p - Cin), (0, 0), (1, 1), (1, 1)))   # (Cin_p,N,Hp,Wp)
    x_flat = jnp.pad(xp.reshape(Cin_p, T).astype(jnp.bfloat16),
                     ((0, 0), (lead, Tp - lead - T)))

    # Stacked-tap weight matrices: column index = k*C + c, k = kh*3 + kw.
    w1p = jnp.pad(w1, ((0, Cout_p - Cout), (0, Cin_p - Cin), (0, 0), (0, 0)))
    w2p = jnp.pad(w2, ((0, Cout_p - Cout), (0, Cout_p - Cout), (0, 0), (0, 0)))
    w1_mat = jnp.transpose(w1p, (0, 2, 3, 1)).reshape(
        Cout_p, 9 * Cin_p).astype(jnp.bfloat16)
    w2_mat = jnp.transpose(w2p, (0, 2, 3, 1)).reshape(
        Cout_p, 9 * Cout_p).astype(jnp.bfloat16)

    def col(v):
        return jnp.pad(v.astype(jnp.float32), (0, Cout_p - Cout)).reshape(Cout_p, 1)

    # Validity mask for window slot j (data-flat position q = j + Wp + 1).
    q = jnp.arange(Qp) + (Wp + 1)
    r = q % P
    hh, ww = r // Wp, r % Wp
    mask = ((q < T) & (hh >= 1) & (hh <= H) & (ww >= 1) & (ww <= W)
            ).astype(jnp.float32)[None, :]                     # (1, Qp)

    kernel = _make_double_conv_kernel(
        Wp=Wp, lead=lead, off=off, Qp=Qp, Tp=Tp,
        Cin_p=Cin_p, Cout_p=Cout_p, inv_count=1.0 / float(N * H * W))

    def full(shape):
        return pl.BlockSpec(shape, lambda i, _n=len(shape): (0,) * _n)

    out_win = pl.pallas_call(
        kernel,
        out_shape=jax.ShapeDtypeStruct((Cout_p, Qp), jnp.bfloat16),
        grid=(1,),
        in_specs=[full((Cin_p, Tp)),
                  full((Cout_p, 9 * Cin_p)), full((Cout_p, 9 * Cout_p)),
                  full((Cout_p, 1)), full((Cout_p, 1)),
                  full((Cout_p, 1)), full((Cout_p, 1)),
                  full((1, Qp))],
        out_specs=full((Cout_p, Qp)),
        scratch_shapes=[
            pltpu.VMEM((Cout_p, Tp), jnp.bfloat16),                  # y1 slab
            pltpu.VMEM((9 * max(Cin_p, Cout_p), Qp), jnp.bfloat16),  # tap stack
        ],
        compiler_params=pltpu.CompilerParams(
            dimension_semantics=("arbitrary",)),
    )(x_flat, w1_mat, w2_mat, col(g1), col(b1), col(g2), col(b2), mask)

    # Window slot j <-> data-flat position q = j + Wp + 1; rebuild NCHW
    # (test/demo only — production should stay in the lane-dense layout).
    flat = jnp.concatenate(
        [jnp.zeros((Cout_p, Wp + 1), out_win.dtype), out_win], axis=1)
    if flat.shape[1] < T:
        flat = jnp.pad(flat, ((0, 0), (0, T - flat.shape[1])))
    y = flat[:Cout, :T].reshape(Cout, N, Hp, Wp)[:, :, 1:H + 1, 1:W + 1]
    return jnp.transpose(y, (1, 0, 2, 3))


# --------------------------- pure-JAX reference ----------------------------

def reference_forward(x, params):
    def conv_bn_relu(x, w, g, b):
        y = lax.conv_general_dilated(x, w, (1, 1), [(1, 1), (1, 1)],
                                     dimension_numbers=('NCHW', 'OIHW', 'NCHW'))
        mean = jnp.mean(y, axis=(0, 2, 3), keepdims=True)
        var = jnp.mean((y - mean) ** 2, axis=(0, 2, 3), keepdims=True)  # biased
        yhat = (y - mean) * lax.rsqrt(var + EPS)
        return jnp.maximum(yhat * g.reshape(1, -1, 1, 1) + b.reshape(1, -1, 1, 1), 0.0)

    y = conv_bn_relu(x, params["w1"], params["g1"], params["b1"])
    return conv_bn_relu(y, params["w2"], params["g2"], params["b2"])


# --------------------------------- main ------------------------------------

if __name__ == "__main__":
    key = jax.random.PRNGKey(0)
    ks = jax.random.split(key, 3)

    # DoubleConv2d(in_channels=4, out_channels=8), NCHW input (2, 4, 16, 16)
    N, Cin, Cout, H, W = 2, 4, 8, 16, 16

    x = jax.random.normal(ks[0], (N, Cin, H, W), jnp.float32)
    params = dict(
        w1=0.2 * jax.random.normal(ks[1], (Cout, Cin, 3, 3), jnp.float32),
        g1=1.0 + 0.1 * jnp.arange(Cout, dtype=jnp.float32),
        b1=0.05 * jnp.arange(Cout, dtype=jnp.float32),
        w2=0.2 * jax.random.normal(ks[2], (Cout, Cout, 3, 3), jnp.float32),
        g2=jnp.ones((Cout,), jnp.float32),
        b2=jnp.zeros((Cout,), jnp.float32),
    )

    out = jax.block_until_ready(double_conv2d_forward(x, params))
    ref = reference_forward(x, params)

    assert out.shape == (N, Cout, H, W), out.shape
    max_err = float(jnp.max(jnp.abs(out - ref)))
    # bf16 MXU operands, bf16 intermediate y1 and bf16 output (f32 accumulation
    # and f32 BN statistics) vs. a pure-f32 reference: loose absolute tolerance
    # on the BN-normalized, O(1)-magnitude outputs.
    assert max_err < 1e-1, f"max abs error too large: {max_err}"

    print("KERNEL_OK")
</pallas_src>

<mosaic_0001>
module attributes {stable_mosaic.version = 11 : i64} {
  func.func @kernel(%arg0: i32, %arg1: memref<8x1024xbf16, #tpu.memory_space<vmem>>, %arg2: memref<8x72xbf16, #tpu.memory_space<vmem>>, %arg3: memref<8x72xbf16, #tpu.memory_space<vmem>>, %arg4: memref<8x1xf32, #tpu.memory_space<vmem>>, %arg5: memref<8x1xf32, #tpu.memory_space<vmem>>, %arg6: memref<8x1xf32, #tpu.memory_space<vmem>>, %arg7: memref<8x1xf32, #tpu.memory_space<vmem>>, %arg8: memref<1x768xf32, #tpu.memory_space<vmem>>, %arg9: memref<8x768xbf16, #tpu.memory_space<vmem>>, %arg10: memref<8x1024xbf16, #tpu.memory_space<vmem>>, %arg11: memref<72x768xbf16, #tpu.memory_space<vmem>>) attributes {dimension_semantics = [#tpu.dimension_semantics<arbitrary>], iteration_bounds = array<i64: 1>, scalar_prefetch = 0 : i64, scratch_operands = 2 : i64, tpu.core_type = #tpu.core_type<tc>, window_params = [{pipeline_mode = #tpu.pipeline_mode<synchronous>, transform_indices = @transform_0, window_bounds = array<i64: 8, 1024>}, {pipeline_mode = #tpu.pipeline_mode<synchronous>, transform_indices = @transform_1, window_bounds = array<i64: 8, 72>}, {pipeline_mode = #tpu.pipeline_mode<synchronous>, transform_indices = @transform_2, window_bounds = array<i64: 8, 72>}, {pipeline_mode = #tpu.pipeline_mode<synchronous>, transform_indices = @transform_3, window_bounds = array<i64: 8, 1>}, {pipeline_mode = #tpu.pipeline_mode<synchronous>, transform_indices = @transform_4, window_bounds = array<i64: 8, 1>}, {pipeline_mode = #tpu.pipeline_mode<synchronous>, transform_indices = @transform_5, window_bounds = array<i64: 8, 1>}, {pipeline_mode = #tpu.pipeline_mode<synchronous>, transform_indices = @transform_6, window_bounds = array<i64: 8, 1>}, {pipeline_mode = #tpu.pipeline_mode<synchronous>, transform_indices = @transform_7, window_bounds = array<i64: 1, 768>}, {pipeline_mode = #tpu.pipeline_mode<synchronous>, transform_indices = @transform_8, window_bounds = array<i64: 8, 768>}]} {
    %c0 = arith.constant 0 : index
    %c0_0 = arith.constant 0 : index
    %0 = vector.load %arg8[%c0, %c0_0] : memref<1x768xf32, #tpu.memory_space<vmem>>, vector<1x768xf32>
    %c0_1 = arith.constant 0 : index
    %c109 = arith.constant 109 : index
    %1 = vector.load %arg1[%c0_1, %c109] : memref<8x1024xbf16, #tpu.memory_space<vmem>>, vector<8x768xbf16>
    %c0_2 = arith.constant 0 : index
    %c0_3 = arith.constant 0 : index
    %2 = vector.load %arg11[%c0_2, %c0_3] : memref<72x768xbf16, #tpu.memory_space<vmem>>, vector<8x768xbf16>
    tpu.vector_store %arg11[%c0_2, %c0_3], %1 {strides = array<i32>} : memref<72x768xbf16, #tpu.memory_space<vmem>>, vector<8x768xbf16>,
    %c0_4 = arith.constant 0 : index
    %c110 = arith.constant 110 : index
    %3 = vector.load %arg1[%c0_4, %c110] : memref<8x1024xbf16, #tpu.memory_space<vmem>>, vector<8x768xbf16>
    %c8 = arith.constant 8 : index
    %c0_5 = arith.constant 0 : index
    %4 = vector.load %arg11[%c8, %c0_5] : memref<72x768xbf16, #tpu.memory_space<vmem>>, vector<8x768xbf16>
    tpu.vector_store %arg11[%c8, %c0_5], %3 {strides = array<i32>} : memref<72x768xbf16, #tpu.memory_space<vmem>>, vector<8x768xbf16>,
    %c0_6 = arith.constant 0 : index
    %c111 = arith.constant 111 : index
    %5 = vector.load %arg1[%c0_6, %c111] : memref<8x1024xbf16, #tpu.memory_space<vmem>>, vector<8x768xbf16>
    %c16 = arith.constant 16 : index
    %c0_7 = arith.constant 0 : index
    %6 = vector.load %arg11[%c16, %c0_7] : memref<72x768xbf16, #tpu.memory_space<vmem>>, vector<8x768xbf16>
    tpu.vector_store %arg11[%c16, %c0_7], %5 {strides = array<i32>} : memref<72x768xbf16, #tpu.memory_space<vmem>>, vector<8x768xbf16>,
    %c0_8 = arith.constant 0 : index
    %c127 = arith.constant 127 : index
    %7 = vector.load %arg1[%c0_8, %c127] : memref<8x1024xbf16, #tpu.memory_space<vmem>>, vector<8x768xbf16>
    %c24 = arith.constant 24 : index
    %c0_9 = arith.constant 0 : index
    %8 = vector.load %arg11[%c24, %c0_9] : memref<72x768xbf16, #tpu.memory_space<vmem>>, vector<8x768xbf16>
    tpu.vector_store %arg11[%c24, %c0_9], %7 {strides = array<i32>} : memref<72x768xbf16, #tpu.memory_space<vmem>>, vector<8x768xbf16>,
    %c0_10 = arith.constant 0 : index
    %c128 = arith.constant 128 : index
    %9 = vector.load %arg1[%c0_10, %c128] : memref<8x1024xbf16, #tpu.memory_space<vmem>>, vector<8x768xbf16>
    %c32 = arith.constant 32 : index
    %c0_11 = arith.constant 0 : index
    %10 = vector.load %arg11[%c32, %c0_11] : memref<72x768xbf16, #tpu.memory_space<vmem>>, vector<8x768xbf16>
    tpu.vector_store %arg11[%c32, %c0_11], %9 {strides = array<i32>} : memref<72x768xbf16, #tpu.memory_space<vmem>>, vector<8x768xbf16>,
    %c0_12 = arith.constant 0 : index
    %c129 = arith.constant 129 : index
    %11 = vector.load %arg1[%c0_12, %c129] : memref<8x1024xbf16, #tpu.memory_space<vmem>>, vector<8x768xbf16>
    %c40 = arith.constant 40 : index
    %c0_13 = arith.constant 0 : index
    %12 = vector.load %arg11[%c40, %c0_13] : memref<72x768xbf16, #tpu.memory_space<vmem>>, vector<8x768xbf16>
    tpu.vector_store %arg11[%c40, %c0_13], %11 {strides = array<i32>} : memref<72x768xbf16, #tpu.memory_space<vmem>>, vector<8x768xbf16>,
    %c0_14 = arith.constant 0 : index
    %c145 = arith.constant 145 : index
    %13 = vector.load %arg1[%c0_14, %c145] : memref<8x1024xbf16, #tpu.memory_space<vmem>>, vector<8x768xbf16>
    %c48 = arith.constant 48 : index
    %c0_15 = arith.constant 0 : index
    %14 = vector.load %arg11[%c48, %c0_15] : memref<72x768xbf16, #tpu.memory_space<vmem>>, vector<8x768xbf16>
    tpu.vector_store %arg11[%c48, %c0_15], %13 {strides = array<i32>} : memref<72x768xbf16, #tpu.memory_space<vmem>>, vector<8x768xbf16>,
    %c0_16 = arith.constant 0 : index
    %c146 = arith.constant 146 : index
    %15 = vector.load %arg1[%c0_16, %c146] : memref<8x1024xbf16, #tpu.memory_space<vmem>>, vector<8x768xbf16>
    %c56 = arith.constant 56 : index
    %c0_17 = arith.constant 0 : index
    %16 = vector.load %arg11[%c56, %c0_17] : memref<72x768xbf16, #tpu.memory_space<vmem>>, vector<8x768xbf16>
    tpu.vector_store %arg11[%c56, %c0_17], %15 {strides = array<i32>} : memref<72x768xbf16, #tpu.memory_space<vmem>>, vector<8x768xbf16>,
    %c0_18 = arith.constant 0 : index
    %c147 = arith.constant 147 : index
    %17 = vector.load %arg1[%c0_18, %c147] : memref<8x1024xbf16, #tpu.memory_space<vmem>>, vector<8x768xbf16>
    %c64 = arith.constant 64 : index
    %c0_19 = arith.constant 0 : index
    %18 = vector.load %arg11[%c64, %c0_19] : memref<72x768xbf16, #tpu.memory_space<vmem>>, vector<8x768xbf16>
    tpu.vector_store %arg11[%c64, %c0_19], %17 {strides = array<i32>} : memref<72x768xbf16, #tpu.memory_space<vmem>>, vector<8x768xbf16>,
    %c0_20 = arith.constant 0 : index
    %c0_21 = arith.constant 0 : index
    %19 = vector.load %arg2[%c0_20, %c0_21] : memref<8x72xbf16, #tpu.memory_space<vmem>>, vector<8x72xbf16>
    %c0_22 = arith.constant 0 : index
    %c0_23 = arith.constant 0 : index
    %20 = vector.load %arg11[%c0_22, %c0_23] : memref<72x768xbf16, #tpu.memory_space<vmem>>, vector<72x768xbf16>
    %cst = arith.constant dense<0.000000e+00> : vector<8x768xf32>
    %21 = tpu.matmul %19, %20, %cst {dimension_numbers = #tpu.dot_dimension_numbers<[1], [0], [0], [1], [0, 0, 1, 1], [], []>} : vector<8x72xbf16>, vector<72x768xbf16>, vector<8x768xf32> -> vector<8x768xf32>
    %22 = vector.broadcast %0 : vector<1x768xf32> to vector<8x768xf32>
    %23 = arith.mulf %21, %22 : vector<8x768xf32>
    %cst_24 = arith.constant dense<0.000000e+00> : vector<8xf32>
    %24 = vector.multi_reduction <add>, %23, %cst_24 [1] : vector<8x768xf32> to vector<8xf32>
    %25 = vector.shape_cast %24 : vector<8xf32> to vector<8x1xf32>
    %cst_25 = arith.constant 0.001953125 : f32
    %26 = vector.broadcast %cst_25 : f32 to vector<8x1xf32>
    %27 = arith.mulf %25, %26 : vector<8x1xf32>
    %28 = arith.mulf %23, %23 : vector<8x768xf32>
    %cst_26 = arith.constant dense<0.000000e+00> : vector<8xf32>
    %29 = vector.multi_reduction <add>, %28, %cst_26 [1] : vector<8x768xf32> to vector<8xf32>
    %30 = vector.shape_cast %29 : vector<8xf32> to vector<8x1xf32>
    %cst_27 = arith.constant 0.001953125 : f32
    %31 = vector.broadcast %cst_27 : f32 to vector<8x1xf32>
    %32 = arith.mulf %30, %31 : vector<8x1xf32>
    %33 = arith.mulf %27, %27 : vector<8x1xf32>
    %34 = arith.subf %32, %33 : vector<8x1xf32>
    %cst_28 = arith.constant 0.000000e+00 : f32
    %35 = vector.broadcast %cst_28 : f32 to vector<8x1xf32>
    %36 = arith.maximumf %34, %35 : vector<8x1xf32>
    %c0_29 = arith.constant 0 : index
    %c0_30 = arith.constant 0 : index
    %37 = vector.load %arg4[%c0_29, %c0_30] : memref<8x1xf32, #tpu.memory_space<vmem>>, vector<8x1xf32>
    %cst_31 = arith.constant 9.99999974E-6 : f32
    %38 = vector.broadcast %cst_31 : f32 to vector<8x1xf32>
    %39 = arith.addf %36, %38 : vector<8x1xf32>
    %40 = math.rsqrt %39 : vector<8x1xf32>
    %41 = arith.mulf %37, %40 : vector<8x1xf32>
    %c0_32 = arith.constant 0 : index
    %c0_33 = arith.constant 0 : index
    %42 = vector.load %arg5[%c0_32, %c0_33] : memref<8x1xf32, #tpu.memory_space<vmem>>, vector<8x1xf32>
    %43 = arith.mulf %27, %41 : vector<8x1xf32>
    %44 = arith.subf %42, %43 : vector<8x1xf32>
    %45 = vector.broadcast %41 : vector<8x1xf32> to vector<8x768xf32>
    %46 = arith.mulf %21, %45 : vector<8x768xf32>
    %47 = vector.broadcast %44 : vector<8x1xf32> to vector<8x768xf32>
    %48 = arith.addf %46, %47 : vector<8x768xf32>
    %cst_34 = arith.constant 0.000000e+00 : f32
    %49 = vector.broadcast %cst_34 : f32 to vector<8x768xf32>
    %50 = arith.maximumf %48, %49 : vector<8x768xf32>
    %51 = vector.broadcast %0 : vector<1x768xf32> to vector<8x768xf32>
    %52 = arith.mulf %50, %51 : vector<8x768xf32>
    %cst_35 = arith.constant 0.000000e+00 : bf16
    %53 = vector.broadcast %cst_35 : bf16 to vector<8x128xbf16>
    %c0_36 = arith.constant 0 : index
    %c0_37 = arith.constant 0 : index
    %54 = vector.load %arg10[%c0_36, %c0_37] : memref<8x1024xbf16, #tpu.memory_space<vmem>>, vector<8x128xbf16>
    tpu.vector_store %arg10[%c0_36, %c0_37], %53 {strides = array<i32>} : memref<8x1024xbf16, #tpu.memory_space<vmem>>, vector<8x128xbf16>,
    %cst_38 = arith.constant 0.000000e+00 : bf16
    %55 = vector.broadcast %cst_38 : bf16 to vector<8x128xbf16>
    %c0_39 = arith.constant 0 : index
    %c896 = arith.constant 896 : index
    %56 = vector.load %arg10[%c0_39, %c896] : memref<8x1024xbf16, #tpu.memory_space<vmem>>, vector<8x128xbf16>
    tpu.vector_store %arg10[%c0_39, %c896], %55 {strides = array<i32>} : memref<8x1024xbf16, #tpu.memory_space<vmem>>, vector<8x128xbf16>,
    %57 = arith.truncf %52 : vector<8x768xf32> to vector<8x768xbf16>
    %c0_40 = arith.constant 0 : index
    %c128_41 = arith.constant 128 : index
    %58 = vector.load %arg10[%c0_40, %c128_41] : memref<8x1024xbf16, #tpu.memory_space<vmem>>, vector<8x768xbf16>
    tpu.vector_store %arg10[%c0_40, %c128_41], %57 {strides = array<i32>} : memref<8x1024xbf16, #tpu.memory_space<vmem>>, vector<8x768xbf16>,
    %c0_42 = arith.constant 0 : index
    %c109_43 = arith.constant 109 : index
    %59 = vector.load %arg10[%c0_42, %c109_43] : memref<8x1024xbf16, #tpu.memory_space<vmem>>, vector<8x768xbf16>
    %c0_44 = arith.constant 0 : index
    %c0_45 = arith.constant 0 : index
    %60 = vector.load %arg11[%c0_44, %c0_45] : memref<72x768xbf16, #tpu.memory_space<vmem>>, vector<8x768xbf16>
    tpu.vector_store %arg11[%c0_44, %c0_45], %59 {strides = array<i32>} : memref<72x768xbf16, #tpu.memory_space<vmem>>, vector<8x768xbf16>,
    %c0_46 = arith.constant 0 : index
    %c110_47 = arith.constant 110 : index
    %61 = vector.load %arg10[%c0_46, %c110_47] : memref<8x1024xbf16, #tpu.memory_space<vmem>>, vector<8x768xbf16>
    %c8_48 = arith.constant 8 : index
    %c0_49 = arith.constant 0 : index
    %62 = vector.load %arg11[%c8_48, %c0_49] : memref<72x768xbf16, #tpu.memory_space<vmem>>, vector<8x768xbf16>
    tpu.vector_store %arg11[%c8_48, %c0_49], %61 {strides = array<i32>} : memref<72x768xbf16, #tpu.memory_space<vmem>>, vector<8x768xbf16>,
    %c0_50 = arith.constant 0 : index
    %c111_51 = arith.constant 111 : index
    %63 = vector.load %arg10[%c0_50, %c111_51] : memref<8x1024xbf16, #tpu.memory_space<vmem>>, vector<8x768xbf16>
    %c16_52 = arith.constant 16 : index
    %c0_53 = arith.constant 0 : index
    %64 = vector.load %arg11[%c16_52, %c0_53] : memref<72x768xbf16, #tpu.memory_space<vmem>>, vector<8x768xbf16>
    tpu.vector_store %arg11[%c16_52, %c0_53], %63 {strides = array<i32>} : memref<72x768xbf16, #tpu.memory_space<vmem>>, vector<8x768xbf16>,
    %c0_54 = arith.constant 0 : index
    %c127_55 = arith.constant 127 : index
    %65 = vector.load %arg10[%c0_54, %c127_55] : memref<8x1024xbf16, #tpu.memory_space<vmem>>, vector<8x768xbf16>
    %c24_56 = arith.constant 24 : index
    %c0_57 = arith.constant 0 : index
    %66 = vector.load %arg11[%c24_56, %c0_57] : memref<72x768xbf16, #tpu.memory_space<vmem>>, vector<8x768xbf16>
    tpu.vector_store %arg11[%c24_56, %c0_57], %65 {strides = array<i32>} : memref<72x768xbf16, #tpu.memory_space<vmem>>, vector<8x768xbf16>,
    %c0_58 = arith.constant 0 : index
    %c128_59 = arith.constant 128 : index
    %67 = vector.load %arg10[%c0_58, %c128_59] : memref<8x1024xbf16, #tpu.memory_space<vmem>>, vector<8x768xbf16>
    %c32_60 = arith.constant 32 : index
    %c0_61 = arith.constant 0 : index
    %68 = vector.load %arg11[%c32_60, %c0_61] : memref<72x768xbf16, #tpu.memory_space<vmem>>, vector<8x768xbf16>
    tpu.vector_store %arg11[%c32_60, %c0_61], %67 {strides = array<i32>} : memref<72x768xbf16, #tpu.memory_space<vmem>>, vector<8x768xbf16>,
    %c0_62 = arith.constant 0 : index
    %c129_63 = arith.constant 129 : index
    %69 = vector.load %arg10[%c0_62, %c129_63] : memref<8x1024xbf16, #tpu.memory_space<vmem>>, vector<8x768xbf16>
    %c40_64 = arith.constant 40 : index
    %c0_65 = arith.constant 0 : index
    %70 = vector.load %arg11[%c40_64, %c0_65] : memref<72x768xbf16, #tpu.memory_space<vmem>>, vector<8x768xbf16>
    tpu.vector_store %arg11[%c40_64, %c0_65], %69 {strides = array<i32>} : memref<72x768xbf16, #tpu.memory_space<vmem>>, vector<8x768xbf16>,
    %c0_66 = arith.constant 0 : index
    %c145_67 = arith.constant 145 : index
    %71 = vector.load %arg10[%c0_66, %c145_67] : memref<8x1024xbf16, #tpu.memory_space<vmem>>, vector<8x768xbf16>
    %c48_68 = arith.constant 48 : index
    %c0_69 = arith.constant 0 : index
    %72 = vector.load %arg11[%c48_68, %c0_69] : memref<72x768xbf16, #tpu.memory_space<vmem>>, vector<8x768xbf16>
    tpu.vector_store %arg11[%c48_68, %c0_69], %71 {strides = array<i32>} : memref<72x768xbf16, #tpu.memory_space<vmem>>, vector<8x768xbf16>,
    %c0_70 = arith.constant 0 : index
    %c146_71 = arith.constant 146 : index
    %73 = vector.load %arg10[%c0_70, %c146_71] : memref<8x1024xbf16, #tpu.memory_space<vmem>>, vector<8x768xbf16>
    %c56_72 = arith.constant 56 : index
    %c0_73 = arith.constant 0 : index
    %74 = vector.load %arg11[%c56_72, %c0_73] : memref<72x768xbf16, #tpu.memory_space<vmem>>, vector<8x768xbf16>
    tpu.vector_store %arg11[%c56_72, %c0_73], %73 {strides = array<i32>} : memref<72x768xbf16, #tpu.memory_space<vmem>>, vector<8x768xbf16>,
    %c0_74 = arith.constant 0 : index
    %c147_75 = arith.constant 147 : index
    %75 = vector.load %arg10[%c0_74, %c147_75] : memref<8x1024xbf16, #tpu.memory_space<vmem>>, vector<8x768xbf16>
    %c64_76 = arith.constant 64 : index
    %c0_77 = arith.constant 0 : index
    %76 = vector.load %arg11[%c64_76, %c0_77] : memref<72x768xbf16, #tpu.memory_space<vmem>>, vector<8x768xbf16>
    tpu.vector_store %arg11[%c64_76, %c0_77], %75 {strides = array<i32>} : memref<72x768xbf16, #tpu.memory_space<vmem>>, vector<8x768xbf16>,
    %c0_78 = arith.constant 0 : index
    %c0_79 = arith.constant 0 : index
    %77 = vector.load %arg3[%c0_78, %c0_79] : memref<8x72xbf16, #tpu.memory_space<vmem>>, vector<8x72xbf16>
    %c0_80 = arith.constant 0 : index
    %c0_81 = arith.constant 0 : index
    %78 = vector.load %arg11[%c0_80, %c0_81] : memref<72x768xbf16, #tpu.memory_space<vmem>>, vector<72x768xbf16>
    %cst_82 = arith.constant dense<0.000000e+00> : vector<8x768xf32>
    %79 = tpu.matmul %77, %78, %cst_82 {dimension_numbers = #tpu.dot_dimension_numbers<[1], [0], [0], [1], [0, 0, 1, 1], [], []>} : vector<8x72xbf16>, vector<72x768xbf16>, vector<8x768xf32> -> vector<8x768xf32>
    %80 = vector.broadcast %0 : vector<1x768xf32> to vector<8x768xf32>
    %81 = arith.mulf %79, %80 : vector<8x768xf32>
    %cst_83 = arith.constant dense<0.000000e+00> : vector<8xf32>
    %82 = vector.multi_reduction <add>, %81, %cst_83 [1] : vector<8x768xf32> to vector<8xf32>
    %83 = vector.shape_cast %82 : vector<8xf32> to vector<8x1xf32>
    %cst_84 = arith.constant 0.001953125 : f32
    %84 = vector.broadcast %cst_84 : f32 to vector<8x1xf32>
    %85 = arith.mulf %83, %84 : vector<8x1xf32>
    %86 = arith.mulf %81, %81 : vector<8x768xf32>
    %cst_85 = arith.constant dense<0.000000e+00> : vector<8xf32>
    %87 = vector.multi_reduction <add>, %86, %cst_85 [1] : vector<8x768xf32> to vector<8xf32>
    %88 = vector.shape_cast %87 : vector<8xf32> to vector<8x1xf32>
    %cst_86 = arith.constant 0.001953125 : f32
    %89 = vector.broadcast %cst_86 : f32 to vector<8x1xf32>
    %90 = arith.mulf %88, %89 : vector<8x1xf32>
    %91 = arith.mulf %85, %85 : vector<8x1xf32>
    %92 = arith.subf %90, %91 : vector<8x1xf32>
    %cst_87 = arith.constant 0.000000e+00 : f32
    %93 = vector.broadcast %cst_87 : f32 to vector<8x1xf32>
    %94 = arith.maximumf %92, %93 : vector<8x1xf32>
    %c0_88 = arith.constant 0 : index
    %c0_89 = arith.constant 0 : index
    %95 = vector.load %arg6[%c0_88, %c0_89] : memref<8x1xf32, #tpu.memory_space<vmem>>, vector<8x1xf32>
    %cst_90 = arith.constant 9.99999974E-6 : f32
    %96 = vector.broadcast %cst_90 : f32 to vector<8x1xf32>
    %97 = arith.addf %94, %96 : vector<8x1xf32>
    %98 = math.rsqrt %97 : vector<8x1xf32>
    %99 = arith.mulf %95, %98 : vector<8x1xf32>
    %c0_91 = arith.constant 0 : index
    %c0_92 = arith.constant 0 : index
    %100 = vector.load %arg7[%c0_91, %c0_92] : memref<8x1xf32, #tpu.memory_space<vmem>>, vector<8x1xf32>
    %101 = arith.mulf %85, %99 : vector<8x1xf32>
    %102 = arith.subf %100, %101 : vector<8x1xf32>
    %103 = vector.broadcast %99 : vector<8x1xf32> to vector<8x768xf32>
    %104 = arith.mulf %79, %103 : vector<8x768xf32>
    %105 = vector.broadcast %102 : vector<8x1xf32> to vector<8x768xf32>
    %106 = arith.addf %104, %105 : vector<8x768xf32>
    %cst_93 = arith.constant 0.000000e+00 : f32
    %107 = vector.broadcast %cst_93 : f32 to vector<8x768xf32>
    %108 = arith.maximumf %106, %107 : vector<8x768xf32>
    %109 = arith.truncf %108 : vector<8x768xf32> to vector<8x768xbf16>
    %c0_94 = arith.constant 0 : index
    %c0_95 = arith.constant 0 : index
    %110 = vector.load %arg9[%c0_94, %c0_95] : memref<8x768xbf16, #tpu.memory_space<vmem>>, vector<8x768xbf16>
    tpu.vector_store %arg9[%c0_94, %c0_95], %109 {strides = array<i32>} : memref<8x768xbf16, #tpu.memory_space<vmem>>, vector<8x768xbf16>,
    return
  }
  func.func @transform_0(%arg0: i32) -> (i32, i32) {
    %c0_i32 = arith.constant 0 : i32
    %c0_i32_0 = arith.constant 0 : i32
    %c0_i32_1 = arith.constant 0 : i32
    return %c0_i32, %c0_i32_0 : i32, i32
  }
  func.func @transform_1(%arg0: i32) -> (i32, i32) {
    %c0_i32 = arith.constant 0 : i32
    %c0_i32_0 = arith.constant 0 : i32
    %c0_i32_1 = arith.constant 0 : i32
    return %c0_i32, %c0_i32_0 : i32, i32
  }
  func.func @transform_2(%arg0: i32) -> (i32, i32) {
    %c0_i32 = arith.constant 0 : i32
    %c0_i32_0 = arith.constant 0 : i32
    %c0_i32_1 = arith.constant 0 : i32
    return %c0_i32, %c0_i32_0 : i32, i32
  }
  func.func @transform_3(%arg0: i32) -> (i32, i32) {
    %c0_i32 = arith.constant 0 : i32
    %c0_i32_0 = arith.constant 0 : i32
    %c0_i32_1 = arith.constant 0 : i32
    return %c0_i32, %c0_i32_0 : i32, i32
  }
  func.func @transform_4(%arg0: i32) -> (i32, i32) {
    %c0_i32 = arith.constant 0 : i32
    %c0_i32_0 = arith.constant 0 : i32
    %c0_i32_1 = arith.constant 0 : i32
    return %c0_i32, %c0_i32_0 : i32, i32
  }
  func.func @transform_5(%arg0: i32) -> (i32, i32) {
    %c0_i32 = arith.constant 0 : i32
    %c0_i32_0 = arith.constant 0 : i32
    %c0_i32_1 = arith.constant 0 : i32
    return %c0_i32, %c0_i32_0 : i32, i32
  }
  func.func @transform_6(%arg0: i32) -> (i32, i32) {
    %c0_i32 = arith.constant 0 : i32
    %c0_i32_0 = arith.constant 0 : i32
    %c0_i32_1 = arith.constant 0 : i32
    return %c0_i32, %c0_i32_0 : i32, i32
  }
  func.func @transform_7(%arg0: i32) -> (i32, i32) {
    %c0_i32 = arith.constant 0 : i32
    %c0_i32_0 = arith.constant 0 : i32
    %c0_i32_1 = arith.constant 0 : i32
    return %c0_i32, %c0_i32_0 : i32, i32
  }
  func.func @transform_8(%arg0: i32) -> (i32, i32) {
    %c0_i32 = arith.constant 0 : i32
    %c0_i32_0 = arith.constant 0 : i32
    %c0_i32_1 = arith.constant 0 : i32
    return %c0_i32, %c0_i32_0 : i32, i32
  }
}

</mosaic_0001>

<bundles_post_ra>
// kernel: tpu_custom_call.1
= control target key start
LH: loop header
LB: loop body
LE: loop exit
PB: predicated region body
PF: predicated region fallthrough
CT: control target
= control target key end

     0   :  { %13 = vsyncpa [#allocation5], 0  ;;  %s2168_s0 = inlined_call_operand.vmem [shape: bf16[8,1024], index: 0, kind: input, shape index: {}]   ;;  %s2169_s1 = inlined_call_operand.hbm [shape: bf16[8,72], index: 1, kind: input, shape index: {}]   ;;  %s2170_s2 = inlined_call_operand.hbm [shape: bf16[8,72], index: 2, kind: input, shape index: {}]   ;;  %s2171_s3 = inlined_call_operand.vmem [shape: f32[8,1], index: 3, kind: input, shape index: {}]   ;;  %s2172_s4 = inlined_call_operand.vmem [shape: f32[8,1], index: 4, kind: input, shape index: {}]   ;;  %s2173_s5 = inlined_call_operand.vmem [shape: f32[8,1], index: 5, kind: input, shape index: {}]   ;;  %s2174_s6 = inlined_call_operand.vmem [shape: f32[8,1], index: 6, kind: input, shape index: {}]   ;;  %s2175_s7 = inlined_call_operand.vmem [shape: f32[1,768], index: 7, kind: input, shape index: {}]   ;;  %s2176_s8 = inlined_call_operand.hbm [shape: bf16[8,768], index: 8, kind: output, shape index: {}]  }
   0x1   :  { %14 = vsyncpa [#allocation8], 0 }
   0x2   :  { %15 = vsyncpa [#allocation6], 0  ;;  %s1614_s27 = smov [#allocation4]   ;;  %s1615_s29 = smov [#allocation7]  }
   0x3   :  { %s24_s28 = sshll.u32 %s1614_s27, 4  ;;  %s34_s30 = sshll.u32 %s1615_s29, 4  ;;  %s25_s28 = int_to_ptr.vmem [resolvable:$true] %s24_s28  ;;  %s35_s30 = int_to_ptr.vmem [resolvable:$true] %s34_s30 }
   0x4   :  { %s1556_s9 = scalar_lea.vmem %s25_s28, 64  ;;  %p1561_p1 = scmp.lt.s32.totalorder %s25_s28, %s25_s28 }
   0x5   :  { %p1557_p0 = scmp.ne.s32.totalorder %s25_s28, %s1556_s9  ;;  %p1562_p2 = scmp.lt.s32.totalorder %s1556_s9, %s1556_s9 }
   0x7   :  { %p1563_p3 = por %p1562_p2, %p1561_p1 }
   0x9   :  { %p1564_p4 = pnand %p1563_p3, %p1557_p0 }
   0xb   :  { %1567 = shalt.err (!%p1564_p4)
}
   0xc   :  { %27 = dma.hbm_to_vmem [thread:$0]  %s2169_s1, 64, %s25_s28, [#allocation5]  }
   0xd   :  { %s1576_s12 = scalar_lea.vmem %s35_s30, 64  ;;  %p1581_p6 = scmp.lt.s32.totalorder %s35_s30, %s35_s30 }
   0xe   :  { %p1577_p5 = scmp.ne.s32.totalorder %s35_s30, %s1576_s12  ;;  %p1582_p7 = scmp.lt.s32.totalorder %s1576_s12, %s1576_s12 }
  0x10   :  { %p1583_p8 = por %p1582_p7, %p1581_p6 }
  0x12   :  { %p1584_p9 = pnand %p1583_p8, %p1577_p5 }
  0x14   :  { %1587 = shalt.err (!%p1584_p9)
}
  0x15   :  { %37 = dma.hbm_to_vmem [thread:$0]  %s2170_s2, 64, %s35_s30, [#allocation8]  }
  0x16   :  { %1608 = dma.done.wait [#allocation5], 64  }
  0x17   :  { %1609 = vsyncadd [#allocation5], 4294967232 }
  0x18   :  { %1610 = dma.done.wait [#allocation8], 64  }
  0x19   :  { %1611 = vsyncadd [#allocation8], 4294967232  ;;  %v1680_v0 = vld [vmem:[%s2168_s0 + $0x4] sm:$0xff]  ;;  %s1616_s1 = smov 109   ;;  %s1617_s17 = smov 111   ;;  %v1689_v1 = vld [vmem:[%s2168_s0 + $0xc] sm:$0xff] }
  0x1a   :  { %302 = vrot.lane.b32.xlu0 %v1680_v0, %s1616_s1  ;;  %236 = vrot.lane.b32.xlu1 %v1680_v0, %s1617_s17  ;;  %s1618_s2 = smov 110   ;;  %s1619_s20 = smov 127   ;;  %v124_v2 = vld [vmem:[%s2168_s0 + $0x8] sm:$0xff]  ;;  %v123_v3 = vld [vmem:[%s2168_s0] sm:$0xff]  ;;  %v1624_v5 = vmov 0   ;;  %vm76_vm0 = vcmask 1043456  }
  0x1b   :  { %s1620_s25 = smov 17   ;;  %s1621_s26 = smov 1   ;;  %v1720_v4 = vld [vmem:[%s2168_s0 + $0x14] sm:$0xff]  ;;  %545 = vmatprep.mubr.bf16.mxu0 %v1624_v5  ;;  %739 = vst [vmem:[#allocation2] sm:$0xf] %v1624_v5  ;;  %586 = vmatprep.mubr.bf16.mxu1 %v1624_v5  ;;  %vm315_vm1 = vcmask 891904  }
  0x1c   :  { %s1622_s27 = smov 19   ;;  %s1623_s28 = smov 18   ;;  %740 = vst [vmem:[#allocation2 + $0x1c] sm:$0xf] %v1624_v5  ;;  %1542 = vset.pattern.permute.xlu0 %v1624_v5  ;;  %1543 = vset.pattern.permute.xlu1 %v1624_v5  ;;  %v297_v6 = vld [vmem:[%s2168_s0 + $0x1c] sm:$0xf] }
  0x1d   :  { %v231_v7 = vld [vmem:[%s2168_s0 + $0x1c] sm:$0xf]  ;;  %v125_v8 = vld [vmem:[%s2168_s0 + $0x10] sm:$0xff]  ;;  %v159_v11 = vld [vmem:[%s2168_s0 + $0x18] sm:$0xf]  ;;  %vm249_vm2 = vcmask 908288  }
  0x1e   :  { %304 = vrot.lane.b32.xlu0 %v1689_v1, %s1616_s1  ;;  %238 = vrot.lane.b32.xlu1 %v1689_v1, %s1617_s17  ;;  %v264_v9 = vld [vmem:[%s2168_s0 + $0x1c] sm:$0xf]  ;;  %v126_v12 = vld [vmem:[%s2168_s0 + $0x18] sm:$0xf]  ;;  %vm282_vm3 = vcmask 900096   ;;  %vm216_vm4 = vcmask 1039360  }
  0x1f   :  { %v198_v10 = vld [vmem:[%s2168_s0 + $0x1c] sm:$0xf]  ;;  %v93_v13 = vld [vmem:[%s2168_s0 + $0x18] sm:$0xf]  ;;  %vm144_vm5 = vcmask 138240   ;;  %vm177_vm6 = vcmask 7168  }
  0x20   :  { %v59_v14 = vld [vmem:[%s2168_s0 + $0x18] sm:$0xf]  ;;  %vm78_vm7 = vcmask 154624   ;;  %vm111_vm8 = vcmask 146432   ;;  %vm490_vm9 = vcmask 588800  }
  0x22   :  { %269 = vrot.lane.b32.xlu0 %v1680_v0, %s1618_s2  ;;  %271 = vrot.lane.b32.xlu1 %v1689_v1, %s1618_s2 }
  0x26   :  { %205 = vrot.lane.b32.xlu1 %v1689_v1, %s1619_s20  ;;  %203 = vrot.lane.b32.xlu0 %v1680_v0, %s1619_s20 }
  0x2a   :  { %133 = vrot.lane.b32.xlu1 %v124_v2, %s1620_s25  ;;  %131 = vrot.lane.b32.xlu0 %v123_v3, %s1620_s25 }
  0x2e   :  { %166 = vrot.lane.b32.xlu1 %v124_v2, %s1621_s26  ;;  %164 = vrot.lane.b32.xlu0 %v123_v3, %s1621_s26 }
  0x32   :  { %66 = vrot.lane.b32.xlu1 %v124_v2, %s1622_s27  ;;  %64 = vrot.lane.b32.xlu0 %v123_v3, %s1622_s27 }
  0x36   :  { %100 = vrot.lane.b32.xlu1 %v124_v2, %s1623_s28  ;;  %98 = vrot.lane.b32.xlu0 %v123_v3, %s1623_s28 }
  0x3a   :  { %240 = vrot.lane.b32.xlu1 %v1720_v4, %s1617_s17  ;;  %306 = vrot.lane.b32.xlu0 %v1720_v4, %s1616_s1 }
  0x3e   :  { %308 = vrot.lane.b32.xlu1 %v297_v6, %s1616_s1  ;;  %273 = vrot.lane.b32.xlu0 %v1720_v4, %s1618_s2 }
  0x42   :  { %242 = vrot.lane.b32.xlu1 %v231_v7, %s1617_s17  ;;  %207 = vrot.lane.b32.xlu0 %v1720_v4, %s1619_s20 }
  0x46   :  { %135 = vrot.lane.b32.xlu1 %v125_v8, %s1620_s25  ;;  %275 = vrot.lane.b32.xlu0 %v264_v9, %s1618_s2 }
  0x4a   :  { %209 = vrot.lane.b32.xlu1 %v198_v10, %s1619_s20  ;;  %168 = vrot.lane.b32.xlu0 %v125_v8, %s1621_s26 }
  0x4e   :  { %102 = vrot.lane.b32.xlu1 %v125_v8, %s1623_s28  ;;  %68 = vrot.lane.b32.xlu0 %v125_v8, %s1622_s27 }
  0x52   :  { %170 = vrot.lane.b32.xlu1 %v159_v11, %s1621_s26  ;;  %137 = vrot.lane.b32.xlu0 %v126_v12, %s1620_s25 }
  0x56   :  { %104 = vrot.lane.b32.xlu1 %v93_v13, %s1623_s28  ;;  %70 = vrot.lane.b32.xlu0 %v59_v14, %s1622_s27 }
  0x8c   :  { %v303_v15 = vpop.permute.xlu0 %302  ;;  %v237_v16 = vpop.permute.xlu1 %236 }
  0x8d   :  { %v310_v19 = vrot.slane %v303_v15, 4  ;;  %v244_v22 = vrot.slane %v237_v16, 4 }
  0x90   :  { %v1775_v17 = vpop.permute.xlu0 %304  ;;  %v1777_v18 = vpop.permute.xlu1 %238 }
  0x91   :  { %v311_v20 = vrot.slane %v1775_v17, 4  ;;  %v245_v21 = vrot.slane %v1777_v18, 4 }
  0x93   :  { %v314_v23 = vsel %vm76_vm0, %v310_v19, %v311_v20  ;;  %v248_v24 = vsel %vm76_vm0, %v244_v22, %v245_v21 }
  0x94   :  { %v270_v25 = vpop.permute.xlu0 %269  ;;  %v1787_v26 = vpop.permute.xlu1 %271  ;;  %v316_v27 = vsel %vm315_vm1, %v303_v15, %v314_v23  ;;  %v250_v36 = vsel %vm249_vm2, %v237_v16, %v248_v24 }
  0x95   :  { %v277_v28 = vrot.slane %v270_v25, 4  ;;  %v278_v29 = vrot.slane %v1787_v26, 4  ;;  %v1471_v30 = vcombine.high %v316_v27, %v316_v27  ;;  %v1470_v31 = vcombine.low %v316_v27, %v316_v27  ;;  %v1843_v27 = vld [vmem:[#allocation4] sm:$0xf] }
  0x97   :  { %v281_v32 = vsel %vm76_vm0, %v277_v28, %v278_v29  ;;  %1476 = vmatprep.subr.msk.bf16.mxu0 %vm76_vm0, %v1471_v30  ;;  %v496_v33 = vsel %vm76_vm0, %v1470_v31, 0 }
  0x98   :  { %520 = vmatpush1.bf16.msra.mxu0 %v496_v33  ;;  %v1796_v34 = vpop.permute.xlu1 %205  ;;  %v204_v35 = vpop.permute.xlu0 %203  ;;  %v283_v37 = vsel %vm282_vm3, %v270_v25, %v281_v32 }
  0x99   :  { %v212_v38 = vrot.slane %v1796_v34, 4  ;;  %v211_v39 = vrot.slane %v204_v35, 4  ;;  %v1465_v40 = vcombine.high %v250_v36, %v283_v37  ;;  %v1464_v41 = vcombine.low %v250_v36, %v283_v37 }
  0x9b   :  { %v215_v42 = vsel %vm76_vm0, %v211_v39, %v212_v38  ;;  %521 = vmatprep.subr.bf16.mxu0 %v1465_v40 }
  0x9c   :  { %v217_v43 = vsel %vm216_vm4, %v204_v35, %v215_v42  ;;  %522 = vmatpush1.bf16.msra.mxu0 %v1464_v41  ;;  %v1805_v44 = vpop.permute.xlu1 %133  ;;  %v132_v45 = vpop.permute.xlu0 %131 }
  0x9d   :  { %v1458_v46 = vcombine.low %v1680_v0, %v217_v43  ;;  %v1459_v47 = vcombine.high %v1680_v0, %v217_v43  ;;  %v140_v48 = vrot.slane %v1805_v44, 4  ;;  %v139_v49 = vrot.slane %v132_v45, 4 }
  0x9f   :  { %523 = vmatprep.subr.bf16.mxu0 %v1459_v47  ;;  %v143_v52 = vsel %vm76_vm0, %v139_v49, %v140_v48 }
  0xa0   :  { %524 = vmatpush1.bf16.msra.mxu0 %v1458_v46  ;;  %v1810_v50 = vpop.permute.xlu1 %166  ;;  %v165_v51 = vpop.permute.xlu0 %164  ;;  %v145_v56 = vsel %vm144_vm5, %v132_v45, %v143_v52 }
  0xa1   :  { %v173_v53 = vrot.slane %v1810_v50, 4  ;;  %v172_v54 = vrot.slane %v165_v51, 4 }
  0xa3   :  { %v176_v55 = vsel %vm76_vm0, %v172_v54, %v173_v53 }
  0xa4   :  { %v178_v57 = vsel %vm177_vm6, %v165_v51, %v176_v55  ;;  %v1821_v58 = vpop.permute.xlu1 %66  ;;  %v65_v59 = vpop.permute.xlu0 %64 }
  0xa5   :  { %v1452_v60 = vcombine.low %v145_v56, %v178_v57  ;;  %v1453_v61 = vcombine.high %v145_v56, %v178_v57  ;;  %v73_v62 = vrot.slane %v1821_v58, 4  ;;  %v72_v63 = vrot.slane %v65_v59, 4 }
  0xa7   :  { %525 = vmatprep.subr.bf16.mxu0 %v1453_v61  ;;  %v77_v3 = vsel %vm76_vm0, %v72_v63, %v73_v62 }
  0xa8   :  { %526 = vmatpush1.bf16.msra.mxu0 %v1452_v60  ;;  %v1824_v0 = vpop.permute.xlu1 %100  ;;  %v99_v2 = vpop.permute.xlu0 %98  ;;  %v79_v9 = vsel %vm78_vm7, %v65_v59, %v77_v3 }
  0xa9   :  { %v107_v6 = vrot.slane %v1824_v0, 4  ;;  %v106_v7 = vrot.slane %v99_v2, 4 }
  0xab   :  { %v110_v8 = vsel %vm76_vm0, %v106_v7, %v107_v6 }
  0xac   :  { %v112_v10 = vsel %vm111_vm8, %v99_v2, %v110_v8  ;;  %v241_v11 = vpop.permute.xlu1 %240  ;;  %v307_v12 = vpop.permute.xlu0 %306 }
  0xad   :  { %v1446_v13 = vcombine.low %v79_v9, %v112_v10  ;;  %v1447_v14 = vcombine.high %v79_v9, %v112_v10  ;;  %v246_v15 = vrot.slane %v241_v11, 4  ;;  %v312_v16 = vrot.slane %v307_v12, 4 }
  0xaf   :  { %527 = vmatprep.subr.bf16.mxu0 %v1447_v14  ;;  %v317_v19 = vsel %vm76_vm0, %v311_v20, %v312_v16  ;;  %v251_v22 = vsel %vm76_vm0, %v245_v21, %v246_v15 }
  0xb0   :  { %v309_v23 = vpop.permute.xlu1 %308  ;;  %528 = vmatpush1.bf16.msra.mxu0 %v1446_v13  ;;  %v274_v24 = vpop.permute.xlu0 %273  ;;  %v318_v25 = vsel %vm315_vm1, %v1775_v17, %v317_v19  ;;  %v252_v37 = vsel %vm249_vm2, %v1777_v18, %v251_v22 }
  0xb1   :  { %v313_v28 = vrot.slane %v309_v23, 4  ;;  %v279_v30 = vrot.slane %v274_v24, 4  ;;  %v1473_v31 = vcombine.high %v318_v25, %v318_v25  ;;  %v1472_v32 = vcombine.low %v318_v25, %v318_v25 }
  0xb3   :  { %v319_v33 = vsel %vm76_vm0, %v312_v16, %v313_v28  ;;  %v284_v20 = vsel %vm76_vm0, %v278_v29, %v279_v30  ;;  %1478 = vmatprep.subr.msk.bf16.mxu1 %vm76_vm0, %v1473_v31  ;;  %v502_v21 = vsel %vm76_vm0, %v1472_v32, 0  ;;  %1477 = vmatmul.mubr.msk.bf16.vlgmr.msra.gmra.mxu0 %vm490_vm9, %v1843_v27 }
  0xb4   :  { %v320_v17 = vsel %vm315_vm1, %v307_v12, %v319_v33  ;;  %v243_v35 = vpop.permute.xlu1 %242  ;;  %561 = vmatpush1.bf16.msra.mxu1 %v502_v21  ;;  %v208_v36 = vpop.permute.xlu0 %207  ;;  %v285_v39 = vsel %vm282_vm3, %v1787_v26, %v284_v20  ;;  %627 = vmatprep.mubr.bf16.mxu0 %v1624_v5 }
  0xb5   :  { %v247_v29 = vrot.slane %v243_v35, 4  ;;  %v213_v40 = vrot.slane %v208_v36, 4  ;;  %v1467_v41 = vcombine.high %v252_v37, %v285_v39  ;;  %v1475_v42 = vcombine.high %v320_v17, %v320_v17 }
  0xb6   :  { %v1466_v43 = vcombine.low %v252_v37, %v285_v39  ;;  %v1474_v45 = vcombine.low %v320_v17, %v320_v17 }
  0xb7   :  { %v218_v46 = vsel %vm76_vm0, %v212_v38, %v213_v40  ;;  %562 = vmatprep.subr.bf16.mxu1 %v1467_v41  ;;  %1480 = vmatprep.subr.msk.bf16.mxu0 %vm76_vm0, %v1475_v42  ;;  %v253_v18 = vsel %vm76_vm0, %v246_v15, %v247_v29 }
  0xb8   :  { %v136_v47 = vpop.permute.xlu1 %135  ;;  %563 = vmatpush1.bf16.msra.mxu1 %v1466_v43  ;;  %v508_v26 = vsel %vm76_vm0, %v1474_v45, 0  ;;  %v276_v49 = vpop.permute.xlu0 %275  ;;  %v219_v51 = vsel %vm216_vm4, %v1796_v34, %v218_v46  ;;  %v254_v61 = vsel %vm249_vm2, %v241_v11, %v253_v18  ;;  %v637_v46 = vlaneseq }
  0xb9   :  { %v141_v52 = vrot.slane %v136_v47, 4  ;;  %602 = vmatpush1.bf16.msra.mxu0 %v508_v26  ;;  %v280_v54 = vrot.slane %v276_v49, 4  ;;  %v1461_v55 = vcombine.high %v1689_v1, %v219_v51  ;;  %v1460_v38 = vcombine.low %v1689_v1, %v219_v51  ;;  %v55_v51 = vld [vmem:[%s2175_s7] sm:$0x3f] }
  0xbb   :  { %v286_v56 = vsel %vm76_vm0, %v279_v30, %v280_v54  ;;  %564 = vmatprep.subr.bf16.mxu1 %v1461_v55  ;;  %v146_v57 = vsel %vm76_vm0, %v140_v48, %v141_v52 }
  0xbc   :  { %v210_v59 = vpop.permute.xlu1 %209  ;;  %565 = vmatpush1.bf16.msra.mxu1 %v1460_v38  ;;  %v169_v60 = vpop.permute.xlu0 %168  ;;  %v287_v34 = vsel %vm282_vm3, %v274_v24, %v286_v56  ;;  %v147_v10 = vsel %vm144_vm5, %v1805_v44, %v146_v57 }
  0xbd   :  { %v214_v63 = vrot.slane %v210_v59, 4  ;;  %v174_v2 = vrot.slane %v169_v60, 4  ;;  %v1468_v3 = vcombine.low %v254_v61, %v287_v34  ;;  %v1469_v7 = vcombine.high %v254_v61, %v287_v34 }
  0xbf   :  { %v220_v1 = vsel %vm76_vm0, %v213_v40, %v214_v63  ;;  %v179_v8 = vsel %vm76_vm0, %v173_v53, %v174_v2  ;;  %603 = vmatprep.subr.bf16.mxu0 %v1469_v7 }
  0xc0   :  { %v103_v9 = vpop.permute.xlu1 %102  ;;  %604 = vmatpush1.bf16.msra.mxu0 %v1468_v3  ;;  %v69_v48 = vpop.permute.xlu0 %68  ;;  %v180_v11 = vsel %vm177_vm6, %v1810_v50, %v179_v8  ;;  %v221_v12 = vsel %vm216_vm4, %v208_v36, %v220_v1 }
  0xc1   :  { %v108_v13 = vrot.slane %v103_v9, 4  ;;  %v74_v14 = vrot.slane %v69_v48, 4  ;;  %v1455_v15 = vcombine.high %v147_v10, %v180_v11  ;;  %v1462_v16 = vcombine.low %v1720_v4, %v221_v12 }
  0xc2   :  { %v1463_v19 = vcombine.high %v1720_v4, %v221_v12  ;;  %v1454_v53 = vcombine.low %v147_v10, %v180_v11 }
  0xc3   :  { %v113_v22 = vsel %vm76_vm0, %v107_v6, %v108_v13  ;;  %v80_v44 = vsel %vm76_vm0, %v73_v62, %v74_v14  ;;  %566 = vmatprep.subr.bf16.mxu1 %v1455_v15 }
  0xc4   :  { %605 = vmatprep.subr.bf16.mxu0 %v1463_v19  ;;  %v171_v50 = vpop.permute.xlu1 %170  ;;  %567 = vmatpush1.bf16.msra.mxu1 %v1454_v53  ;;  %v138_v23 = vpop.permute.xlu0 %137  ;;  %v81_v24 = vsel %vm78_vm7, %v1821_v58, %v80_v44  ;;  %v114_v4 = vsel %vm111_vm8, %v1824_v0, %v113_v22 }
  0xc5   :  { %v175_v25 = vrot.slane %v171_v50, 4  ;;  %606 = vmatpush1.bf16.msra.mxu0 %v1462_v16  ;;  %v142_v28 = vrot.slane %v138_v23, 4  ;;  %v1449_v30 = vcombine.high %v81_v24, %v114_v4  ;;  %v1448_v6 = vcombine.low %v81_v24, %v114_v4 }
  0xc7   :  { %v181_v31 = vsel %vm76_vm0, %v174_v2, %v175_v25  ;;  %v148_v62 = vsel %vm76_vm0, %v141_v52, %v142_v28  ;;  %568 = vmatprep.subr.bf16.mxu1 %v1449_v30 }
  0xc8   :  { %v105_v32 = vpop.permute.xlu1 %104  ;;  %569 = vmatpush1.bf16.msra.mxu1 %v1448_v6  ;;  %v71_v33 = vpop.permute.xlu0 %70  ;;  %v149_v20 = vsel %vm144_vm5, %v136_v47, %v148_v62  ;;  %v182_v58 = vsel %vm177_vm6, %v169_v60, %v181_v31  ;;  %v638_v47 = vshrl.u32 %v637_v46, 7  ;;  %v1001_v46 = vld [vmem:[#allocation2 + $0x1c] sm:$0xf] }
  0xc9   :  { %v109_v21 = vrot.slane %v105_v32, 4  ;;  %v75_v17 = vrot.slane %v71_v33, 4  ;;  %v1456_v0 = vcombine.low %v149_v20, %v182_v58  ;;  %v1457_v35 = vcombine.high %v149_v20, %v182_v58 }
  0xca   :  { %v639_v26 = vsub.s32 0, %v638_v47  ;;  %v643_v49 = vsub.s32 1, %v638_v47  ;;  %v651_v55 = vsub.s32 3, %v638_v47  ;;  %v655_v2 = vsub.s32 4, %v638_v47 }
  0xcb   :  { %v115_v36 = vsel %vm76_vm0, %v108_v13, %v109_v21  ;;  %v82_v37 = vsel %vm76_vm0, %v74_v14, %v75_v17  ;;  %1479 = vmatmul.mubr.msk.bf16.vlgmr.msra.gmra.mxu1 %vm490_vm9, %v1843_v27  ;;  %607 = vmatprep.subr.bf16.mxu0 %v1457_v35 }
  0xcc   :  { %608 = vmatpush1.bf16.msra.mxu0 %v1456_v0  ;;  %v83_v39 = vsel %vm78_vm7, %v69_v48, %v82_v37  ;;  %v116_v29 = vsel %vm111_vm8, %v103_v9, %v115_v36  ;;  %1246 = vmatprep.mubr.bf16.mxu1 %v1624_v5  ;;  %v1917_v52 = vrot.slane %v55_v51, %v639_v26  ;;  %v659_v9 = vsub.s32 5, %v638_v47  ;;  %v698_v36 = vld [vmem:[%s2171_s3] sm:$0xff] }
  0xcd   :  { %v1450_v40 = vcombine.low %v83_v39, %v116_v29  ;;  %v1451_v41 = vcombine.high %v83_v39, %v116_v29  ;;  %v1919_v54 = vrot.slane %v55_v51, %v643_v49  ;;  %v1927_v59 = vrot.slane %v55_v51, %v651_v55  ;;  %v702_v29 = vld [vmem:[%s2172_s4] sm:$0xff] }
  0xce   :  { %v1931_v12 = vrot.slane %v55_v51, %v655_v2  ;;  %v1933_v16 = vrot.slane %v55_v51, %v659_v9 }
  0xcf   :  { %609 = vmatprep.subr.bf16.mxu0 %v1451_v41 }
  0xd0   :  { %610 = vmatpush1.bf16.msra.mxu0 %v1450_v40 }
  0xd3   :  { %1481 = vmatmul.mubr.msk.bf16.vlgmr.msra.gmra.mxu0 %vm490_vm9, %v1843_v27  ;;  %v647_v27 = vsub.s32 2, %v638_v47  ;;  %v905_v47 = vld [vmem:[#allocation2 + $0x1c] sm:$0xf] }
  0xd4   :  { %1287 = vmatprep.mubr.bf16.mxu0 %v1624_v5 }
  0xd5   :  { %v1925_v57 = vrot.slane %v55_v51, %v647_v27 }
 0x173   :  { %v1910_v42 = vpop.f32.mrf.mxu0 }
 0x174   :  { %v667_v38 = vmul.f32 %v1917_v52, %v1910_v42 }
 0x175   :  { %v1912_v43 = vpop.f32.mrf.mxu0 }
 0x176   :  { %v668_v56 = vmul.f32 %v1919_v54, %v1912_v43  ;;  %v681_v61 = vmul.f32 %v667_v38, %v667_v38 }
 0x177   :  { %v551_v45 = vpop.f32.mrf.mxu0 }
 0x178   :  { %v682_v34 = vmul.f32 %v668_v56, %v668_v56  ;;  %v673_v7 = vadd.f32 %v668_v56, %v667_v38  ;;  %v969_v45 = vld [vmem:[#allocation2 + $0x1c] sm:$0xf] }
 0x179   :  { %v552_v18 = vpop.f32.mrf.mxu0 }
 0x17a   :  { %v687_v10 = vadd.f32 %v682_v34, %v681_v61  ;;  %v937_v18 = vld [vmem:[#allocation2 + $0x1c] sm:$0xf] }
 0x18b   :  { %v588_v60 = vpop.f32.mrf.mxu1 }
 0x18c   :  { %v669_v63 = vmul.f32 %v1925_v57, %v588_v60 }
 0x18d   :  { %v590_v3 = vpop.f32.mrf.mxu1 }
 0x18e   :  { %v683_v1 = vmul.f32 %v669_v63, %v669_v63  ;;  %v670_v8 = vmul.f32 %v1927_v59, %v590_v3  ;;  %v674_v11 = vadd.f32 %v673_v7, %v669_v63 }
 0x18f   :  { %v592_v48 = vpop.f32.mrf.mxu1 }
 0x190   :  { %v688_v14 = vadd.f32 %v687_v10, %v683_v1  ;;  %v684_v15 = vmul.f32 %v670_v8, %v670_v8  ;;  %v675_v53 = vadd.f32 %v674_v11, %v670_v8 }
 0x191   :  { %v593_v13 = vpop.f32.mrf.mxu1 }
 0x192   :  { %v689_v4 = vadd.f32 %v688_v14, %v684_v15 }
 0x193   :  { %v629_v19 = vpop.f32.mrf.mxu0 }
 0x194   :  { %v671_v22 = vmul.f32 %v1931_v12, %v629_v19 }
 0x195   :  { %v631_v44 = vpop.f32.mrf.mxu0 }
 0x196   :  { %v685_v50 = vmul.f32 %v671_v22, %v671_v22  ;;  %v672_v23 = vmul.f32 %v1933_v16, %v631_v44  ;;  %v676_v24 = vadd.f32 %v675_v53, %v671_v22 }
 0x197   :  { %v633_v25 = vpop.f32.mrf.mxu0 }
 0x198   :  { %v677_v28 = vadd.f32 %v676_v24, %v672_v23  ;;  %v686_v30 = vmul.f32 %v672_v23, %v672_v23  ;;  %v690_v6 = vadd.f32 %v689_v4, %v685_v50 }
 0x199   :  { %v634_v31 = vpop.f32.mrf.mxu0 }
 0x19a   :  { %678 = vadd.xlane.f32.xlu0 %v677_v28  ;;  %v691_v62 = vadd.f32 %v690_v6, %v686_v30 }
 0x19c   :  { %692 = vadd.xlane.f32.xlu1 %v691_v62 }
 0x223   :  { %v679_v32 = vpop.xlane.xlu0 %678 }
 0x224   :  { %v680_v33 = vmul.f32 0.001953125, %v679_v32 }
 0x225   :  { %v693_v20 = vpop.xlane.xlu1 %692 }
 0x226   :  { %v695_v58 = vmul.f32 %v680_v33, %v680_v33  ;;  %v694_v21 = vmul.f32 0.001953125, %v693_v20 }
 0x228   :  { %v696_v17 = vsub.f32 %v694_v21, %v695_v58 }
 0x22a   :  { %v697_v0 = vmax.f32 %v696_v17, 0.0 }
 0x22c   :  { %v699_v35 = vadd.f32 1e-05, %v697_v0 }
 0x22e   :  { %1544 = vrsqrt.f32 %v699_v35 }
 0x23b   :  { %v1545_v37 = vpop.eup %1544 }
 0x23c   :  { %v701_v39 = vmul.f32 %v1545_v37, %v698_v36 }
 0x23e   :  { %707 = vperm.xlu0 %1542, %v701_v39   ;;  %v703_v40 = vmul.f32 %v701_v39, %v680_v33 }
 0x240   :  { %v704_v41 = vsub.f32 %v702_v29, %v703_v40 }
 0x242   :  { %718 = vperm.xlu1 %1543, %v704_v41   ;;  %980 = vrot.lane.b32.xlu0 %v969_v45, %s1618_s2 }
 0x246   :  { %1012 = vrot.lane.b32.xlu1 %v1001_v46, %s1616_s1 }
 0x24a   :  { %948 = vrot.lane.b32.xlu1 %v937_v18, %s1617_s17 }
 0x24e   :  { %916 = vrot.lane.b32.xlu1 %v905_v47, %s1619_s20 }
 0x2b9   :  { %v708_v26 = vpop.permute.xlu0 %707 }
 0x2ba   :  { %v710_v49 = vmul.f32 %v708_v26, %v1910_v42  ;;  %v711_v51 = vmul.f32 %v708_v26, %v1912_v43  ;;  %v712_v27 = vmul.f32 %v708_v26, %v588_v60  ;;  %v713_v55 = vmul.f32 %v708_v26, %v590_v3 }
 0x2bb   :  { %v714_v38 = vmul.f32 %v708_v26, %v629_v19  ;;  %v715_v56 = vmul.f32 %v708_v26, %v631_v44 }
 0x2bd   :  { %v719_v61 = vpop.permute.xlu1 %718  ;;  %v2010_v32 = vpop.permute.xlu0 %980 }
 0x2be   :  { %v721_v34 = vadd.f32 %v719_v61, %v710_v49  ;;  %v722_v63 = vadd.f32 %v719_v61, %v711_v51  ;;  %v723_v2 = vadd.f32 %v719_v61, %v712_v27  ;;  %v724_v7 = vadd.f32 %v719_v61, %v713_v55 }
 0x2bf   :  { %v725_v1 = vadd.f32 %v719_v61, %v714_v38  ;;  %v726_v8 = vadd.f32 %v719_v61, %v715_v56 }
 0x2c0   :  { %v727_v9 = vmax.f32 %v721_v34, 0.0  ;;  %v728_v48 = vmax.f32 %v722_v63, 0.0  ;;  %v729_v10 = vmax.f32 %v723_v2, 0.0  ;;  %v730_v11 = vmax.f32 %v724_v7, 0.0 }
 0x2c1   :  { %v731_v13 = vmax.f32 %v725_v1, 0.0  ;;  %v732_v14 = vmax.f32 %v726_v8, 0.0  ;;  %v2004_v6 = vpop.permute.xlu1 %1012 }
 0x2c2   :  { %v733_v42 = vmul.f32 %v727_v9, %v1917_v52  ;;  %v734_v43 = vmul.f32 %v728_v48, %v1919_v54  ;;  %v735_v60 = vmul.f32 %v729_v10, %v1925_v57  ;;  %v736_v3 = vmul.f32 %v730_v11, %v1927_v59 }
 0x2c3   :  { %v737_v15 = vmul.f32 %v731_v13, %v1931_v12  ;;  %v738_v19 = vmul.f32 %v732_v14, %v1933_v16 }
 0x2c4   :  { %v1955_v53 = vpack.c.bf16 %v734_v43, %v733_v42  ;;  %v1957_v22 = vpack.c.bf16 %v736_v3, %v735_v60 }
 0x2c5   :  { %v1959_v44 = vpack.c.bf16 %v738_v19, %v737_v15  ;;  %v2006_v31 = vpop.permute.xlu1 %948 }
 0x2c6   :  { %765 = vst [vmem:[#allocation2 + $0x4] sm:$0xff] %v1955_v53  ;;  %766 = vst [vmem:[#allocation2 + $0xc] sm:$0xff] %v1957_v22  ;;  %1006 = vrot.lane.b32.xlu1 %v1955_v53, %s1616_s1  ;;  %910 = vrot.lane.b32.xlu0 %v1955_v53, %s1619_s20 }
 0x2c7   :  { %767 = vst [vmem:[#allocation2 + $0x14] sm:$0xff] %v1959_v44 }
 0x2c9   :  { %v2008_v62 = vpop.permute.xlu1 %916 }
 0x2ca   :  { %1008 = vrot.lane.b32.xlu1 %v1957_v22, %s1616_s1 }
 0x2cd   :  { %v832_v50 = vld [vmem:[#allocation2] sm:$0xff]  ;;  %v833_v23 = vld [vmem:[#allocation2 + $0x8] sm:$0xff] }
 0x2ce   :  { %840 = vrot.lane.b32.xlu0 %v832_v50, %s1620_s25  ;;  %942 = vrot.lane.b32.xlu1 %v1955_v53, %s1617_s17  ;;  %v866_v24 = vld [vmem:[#allocation2 + $0x10] sm:$0xff]  ;;  %v835_v4 = vld [vmem:[#allocation2 + $0x18] sm:$0xf] }
 0x2cf   :  { %v771_v25 = vld [vmem:[#allocation2 + $0x18] sm:$0xf] }
 0x2d0   :  { %v867_v28 = vld [vmem:[#allocation2 + $0x18] sm:$0xf] }
 0x2d1   :  { %v803_v30 = vld [vmem:[#allocation2 + $0x18] sm:$0xf] }
 0x2d2   :  { %872 = vrot.lane.b32.xlu0 %v832_v50, %s1621_s26  ;;  %944 = vrot.lane.b32.xlu1 %v1957_v22, %s1617_s17 }
 0x2d6   :  { %776 = vrot.lane.b32.xlu0 %v832_v50, %s1622_s27  ;;  %974 = vrot.lane.b32.xlu1 %v1955_v53, %s1618_s2 }
 0x2da   :  { %808 = vrot.lane.b32.xlu0 %v832_v50, %s1623_s28  ;;  %976 = vrot.lane.b32.xlu1 %v1957_v22, %s1618_s2 }
 0x2de   :  { %1010 = vrot.lane.b32.xlu0 %v1959_v44, %s1616_s1  ;;  %912 = vrot.lane.b32.xlu1 %v1957_v22, %s1619_s20 }
 0x2e2   :  { %978 = vrot.lane.b32.xlu0 %v1959_v44, %s1618_s2  ;;  %842 = vrot.lane.b32.xlu1 %v833_v23, %s1620_s25 }
 0x2e6   :  { %914 = vrot.lane.b32.xlu0 %v1959_v44, %s1619_s20  ;;  %874 = vrot.lane.b32.xlu1 %v833_v23, %s1621_s26 }
 0x2ea   :  { %876 = vrot.lane.b32.xlu0 %v866_v24, %s1621_s26  ;;  %778 = vrot.lane.b32.xlu1 %v833_v23, %s1622_s27 }
 0x2ee   :  { %780 = vrot.lane.b32.xlu0 %v866_v24, %s1622_s27  ;;  %810 = vrot.lane.b32.xlu1 %v833_v23, %s1623_s28 }
 0x2f2   :  { %846 = vrot.lane.b32.xlu0 %v835_v4, %s1620_s25  ;;  %946 = vrot.lane.b32.xlu1 %v1959_v44, %s1617_s17 }
 0x2f6   :  { %782 = vrot.lane.b32.xlu0 %v771_v25, %s1622_s27  ;;  %844 = vrot.lane.b32.xlu1 %v866_v24, %s1620_s25 }
 0x2fa   :  { %812 = vrot.lane.b32.xlu1 %v866_v24, %s1623_s28 }
 0x2fe   :  { %878 = vrot.lane.b32.xlu1 %v867_v28, %s1621_s26 }
 0x302   :  { %814 = vrot.lane.b32.xlu1 %v803_v30, %s1623_s28 }
 0x338   :  { %v1007_v33 = vpop.permute.xlu1 %1006  ;;  %v911_v20 = vpop.permute.xlu0 %910 }
 0x339   :  { %v1014_v21 = vrot.slane %v1007_v33, 4  ;;  %v918_v61 = vrot.slane %v911_v20, 4 }
 0x33c   :  { %v1009_v58 = vpop.permute.xlu1 %1008 }
 0x33d   :  { %v1015_v17 = vrot.slane %v1009_v58, 4 }
 0x33f   :  { %v1018_v0 = vsel %vm76_vm0, %v1014_v21, %v1015_v17 }
 0x340   :  { %v841_v35 = vpop.permute.xlu0 %840  ;;  %v943_v36 = vpop.permute.xlu1 %942  ;;  %v1019_v37 = vsel %vm315_vm1, %v1007_v33, %v1018_v0 }
 0x341   :  { %v1510_v39 = vcombine.high %v1019_v37, %v1019_v37  ;;  %v1509_v29 = vcombine.low %v1019_v37, %v1019_v37  ;;  %v950_v26 = vrot.slane %v943_v36, 4  ;;  %v848_v23 = vrot.slane %v841_v35, 4 }
 0x343   :  { %1515 = vmatprep.subr.msk.bf16.mxu1 %vm76_vm0, %v1510_v39  ;;  %v1197_v40 = vsel %vm76_vm0, %v1509_v29, 0 }
 0x344   :  { %v873_v41 = vpop.permute.xlu0 %872  ;;  %1221 = vmatpush1.bf16.msra.mxu1 %v1197_v40  ;;  %v2016_v45 = vpop.permute.xlu1 %944 }
 0x345   :  { %v951_v47 = vrot.slane %v2016_v45, 4  ;;  %v880_v28 = vrot.slane %v873_v41, 4 }
 0x347   :  { %v954_v27 = vsel %vm76_vm0, %v950_v26, %v951_v47 }
 0x348   :  { %v2018_v46 = vpop.permute.xlu0 %776  ;;  %v975_v18 = vpop.permute.xlu1 %974  ;;  %v955_v2 = vsel %vm249_vm2, %v943_v36, %v954_v27  ;;  %v1017_v36 = vrot.slane %v2004_v6, 4 }
 0x349   :  { %v982_v55 = vrot.slane %v975_v18, 4  ;;  %v784_v29 = vrot.slane %v2018_v46, 4 }
 0x34c   :  { %v2021_v49 = vpop.permute.xlu0 %808  ;;  %v2023_v51 = vpop.permute.xlu1 %976 }
 0x34d   :  { %v983_v38 = vrot.slane %v2023_v51, 4  ;;  %v816_v26 = vrot.slane %v2021_v49, 4 }
 0x34f   :  { %v986_v56 = vsel %vm76_vm0, %v982_v55, %v983_v38 }
 0x350   :  { %v1011_v34 = vpop.permute.xlu0 %1010  ;;  %v2032_v63 = vpop.permute.xlu1 %912  ;;  %v987_v7 = vsel %vm282_vm3, %v975_v18, %v986_v56 }
 0x351   :  { %v1016_v1 = vrot.slane %v1011_v34, 4  ;;  %v919_v8 = vrot.slane %v2032_v63, 4  ;;  %v1503_v9 = vcombine.low %v955_v2, %v987_v7  ;;  %v1504_v48 = vcombine.high %v955_v2, %v987_v7 }
 0x352   :  { %v985_v2 = vrot.slane %v2010_v32, 4 }
 0x353   :  { %v1020_v10 = vsel %vm76_vm0, %v1015_v17, %v1016_v1  ;;  %v922_v11 = vsel %vm76_vm0, %v918_v61, %v919_v8  ;;  %1222 = vmatprep.subr.bf16.mxu1 %v1504_v48  ;;  %v1022_v40 = vsel %vm76_vm0, %v1016_v1, %v1017_v36  ;;  %v953_v48 = vrot.slane %v2006_v31, 4 }
 0x354   :  { %v2039_v13 = vpop.permute.xlu0 %978  ;;  %v1021_v14 = vsel %vm315_vm1, %v1009_v58, %v1020_v10  ;;  %1223 = vmatpush1.bf16.msra.mxu1 %v1503_v9  ;;  %v2042_v42 = vpop.permute.xlu1 %842  ;;  %v923_v43 = vsel %vm216_vm4, %v911_v20, %v922_v11  ;;  %v1023_v56 = vsel %vm315_vm1, %v1011_v34, %v1022_v40 }
 0x355   :  { %v1512_v60 = vcombine.high %v1021_v14, %v1021_v14  ;;  %v1511_v3 = vcombine.low %v1021_v14, %v1021_v14  ;;  %v849_v15 = vrot.slane %v2042_v42, 4  ;;  %v1497_v19 = vcombine.low %v1955_v53, %v923_v43 }
 0x356   :  { %v1498_v50 = vcombine.high %v1955_v53, %v923_v43  ;;  %v984_v6 = vrot.slane %v2039_v13, 4  ;;  %v921_v43 = vrot.slane %v2008_v62, 4 }
 0x357   :  { %1517 = vmatprep.subr.msk.bf16.mxu0 %vm76_vm0, %v1512_v60  ;;  %v1203_v4 = vsel %vm76_vm0, %v1511_v3, 0  ;;  %v852_v33 = vsel %vm76_vm0, %v848_v23, %v849_v15  ;;  %v1513_v60 = vcombine.low %v1023_v56, %v1023_v56  ;;  %v1514_v3 = vcombine.high %v1023_v56, %v1023_v56 }
 0x358   :  { %v2049_v24 = vpop.permute.xlu0 %914  ;;  %1224 = vmatprep.subr.bf16.mxu1 %v1498_v50  ;;  %v2052_v25 = vpop.permute.xlu1 %874  ;;  %1262 = vmatpush1.bf16.msra.mxu0 %v1203_v4  ;;  %v853_v0 = vsel %vm144_vm5, %v841_v35, %v852_v33  ;;  %v988_v34 = vsel %vm76_vm0, %v983_v38, %v984_v6 }
 0x359   :  { %1225 = vmatpush1.bf16.msra.mxu1 %v1497_v19  ;;  %v881_v30 = vrot.slane %v2052_v25, 4  ;;  %v920_v27 = vrot.slane %v2049_v24, 4 }
 0x35b   :  { %v884_v53 = vsel %vm76_vm0, %v880_v28, %v881_v30  ;;  %v924_v32 = vsel %vm76_vm0, %v919_v8, %v920_v27  ;;  %v926_v19 = vsel %vm76_vm0, %v920_v27, %v921_v43  ;;  %v2101_v8 = vld [vmem:[#allocation7] sm:$0xf] }
 0x35c   :  { %v2059_v20 = vpop.permute.xlu0 %876  ;;  %v2061_v58 = vpop.permute.xlu1 %778  ;;  %v885_v21 = vsel %vm177_vm6, %v873_v41, %v884_v53  ;;  %v925_v33 = vsel %vm216_vm4, %v2032_v63, %v924_v32  ;;  %v927_v36 = vsel %vm216_vm4, %v2049_v24, %v926_v19 }
 0x35d   :  { %v785_v17 = vrot.slane %v2061_v58, 4  ;;  %v1491_v37 = vcombine.low %v853_v0, %v885_v21  ;;  %v1492_v39 = vcombine.high %v853_v0, %v885_v21  ;;  %v882_v62 = vrot.slane %v2059_v20, 4 }
 0x35e   :  { %v1502_v40 = vcombine.high %v1959_v44, %v927_v36  ;;  %v1499_v56 = vcombine.low %v1957_v22, %v925_v33 }
 0x35f   :  { %1226 = vmatprep.subr.bf16.mxu1 %v1492_v39  ;;  %v788_v41 = vsel %vm76_vm0, %v784_v29, %v785_v17  ;;  %v886_v63 = vsel %vm76_vm0, %v881_v30, %v882_v62  ;;  %v1500_v29 = vcombine.high %v1957_v22, %v925_v33 }
 0x360   :  { %v2069_v18 = vpop.permute.xlu1 %810  ;;  %1227 = vmatpush1.bf16.msra.mxu1 %v1491_v37  ;;  %v2078_v55 = vpop.permute.xlu0 %780  ;;  %v789_v1 = vsel %vm78_vm7, %v2018_v46, %v788_v41  ;;  %v990_v46 = vsel %vm76_vm0, %v984_v6, %v985_v2  ;;  %v887_v30 = vsel %vm177_vm6, %v2052_v25, %v886_v63 }
 0x361   :  { %v817_v35 = vrot.slane %v2069_v18, 4  ;;  %v991_v53 = vsel %vm282_vm3, %v2039_v13, %v990_v46  ;;  %v786_v39 = vrot.slane %v2078_v55, 4 }
 0x363   :  { %v820_v61 = vsel %vm76_vm0, %v816_v26, %v817_v35 }
 0x364   :  { %v947_v7 = vpop.permute.xlu1 %946  ;;  %v821_v9 = vsel %vm111_vm8, %v2021_v49, %v820_v61  ;;  %v847_v50 = vpop.permute.xlu0 %846  ;;  %v790_v61 = vsel %vm76_vm0, %v785_v17, %v786_v39 }
 0x365   :  { %v952_v10 = vrot.slane %v947_v7, 4  ;;  %v1485_v11 = vcombine.low %v789_v1, %v821_v9  ;;  %v1486_v14 = vcombine.high %v789_v1, %v821_v9  ;;  %v851_v6 = vrot.slane %v847_v50, 4 }
 0x366   :  { %v791_v22 = vsel %vm78_vm7, %v2061_v58, %v790_v61 }
 0x367   :  { %v956_v49 = vsel %vm76_vm0, %v951_v47, %v952_v10  ;;  %v958_v31 = vsel %vm76_vm0, %v952_v10, %v953_v48  ;;  %1228 = vmatprep.subr.bf16.mxu1 %v1486_v14  ;;  %v989_v47 = vsel %vm282_vm3, %v2023_v51, %v988_v34  ;;  %v1209_v51 = vsel %vm76_vm0, %v1513_v60, 0 }
 0x368   :  { %v959_v23 = vsel %vm249_vm2, %v947_v7, %v958_v31  ;;  %1229 = vmatpush1.bf16.msra.mxu1 %v1485_v11  ;;  %v845_v38 = vpop.permute.xlu1 %844  ;;  %v957_v4 = vsel %vm249_vm2, %v2016_v45, %v956_v49  ;;  %v783_v26 = vpop.permute.xlu0 %782 }
 0x369   :  { %v850_v28 = vrot.slane %v845_v38, 4  ;;  %1519 = vmatprep.subr.msk.bf16.mxu1 %vm76_vm0, %v1514_v3  ;;  %v1505_v21 = vcombine.low %v957_v4, %v989_v47  ;;  %v1506_v0 = vcombine.high %v957_v4, %v989_v47  ;;  %v1508_v37 = vcombine.high %v959_v23, %v991_v53 }
 0x36a   :  { %v1507_v41 = vcombine.low %v959_v23, %v991_v53  ;;  %v787_v7 = vrot.slane %v783_v26, 4 }
 0x36b   :  { %v854_v45 = vsel %vm76_vm0, %v849_v15, %v850_v28  ;;  %1516 = vmatmul.mubr.msk.bf16.vlgmr.msra.gmra.mxu1 %vm490_vm9, %v2101_v8  ;;  %1263 = vmatprep.subr.bf16.mxu0 %v1506_v0  ;;  %v856_v1 = vsel %vm76_vm0, %v850_v28, %v851_v6 }
 0x36c   :  { %1303 = vmatpush1.bf16.msra.mxu1 %v1209_v51  ;;  %v813_v13 = vpop.permute.xlu1 %812  ;;  %1264 = vmatpush1.bf16.msra.mxu0 %v1505_v21  ;;  %v855_v15 = vsel %vm144_vm5, %v2042_v42, %v854_v45  ;;  %v857_v48 = vsel %vm144_vm5, %v845_v38, %v856_v1  ;;  %v792_v43 = vsel %vm76_vm0, %v786_v39, %v787_v7 }
 0x36d   :  { %v818_v24 = vrot.slane %v813_v13, 4  ;;  %1304 = vmatprep.subr.bf16.mxu1 %v1508_v37  ;;  %1265 = vmatprep.subr.bf16.mxu0 %v1500_v29  ;;  %v1494_v2 = vcombine.high %v855_v15, %v887_v30  ;;  %v1493_v9 = vcombine.low %v855_v15, %v887_v30  ;;  %v793_v32 = vsel %vm78_vm7, %v2078_v55, %v792_v43 }
 0x36e   :  { %1328 = vmatprep.mubr.bf16.mxu1 %v1624_v5 }
 0x36f   :  { %v822_v27 = vsel %vm76_vm0, %v817_v35, %v818_v24  ;;  %v1501_v35 = vcombine.low %v1959_v44, %v927_v36 }
 0x370   :  { %1305 = vmatpush1.bf16.msra.mxu1 %v1507_v41  ;;  %v879_v42 = vpop.permute.xlu1 %878  ;;  %1266 = vmatpush1.bf16.msra.mxu0 %v1499_v56  ;;  %v823_v25 = vsel %vm111_vm8, %v2069_v18, %v822_v27 }
 0x371   :  { %v883_v5 = vrot.slane %v879_v42, 4  ;;  %1306 = vmatprep.subr.bf16.mxu1 %v1502_v40  ;;  %1267 = vmatprep.subr.bf16.mxu0 %v1494_v2  ;;  %v1488_v11 = vcombine.high %v791_v22, %v823_v25  ;;  %v1487_v34 = vcombine.low %v791_v22, %v823_v25  ;;  %v1372_v25 = vld [vmem:[%s2174_s6] sm:$0xff] }
 0x373   :  { %v888_v17 = vsel %vm76_vm0, %v882_v62, %v883_v5 }
 0x374   :  { %1307 = vmatpush1.bf16.msra.mxu1 %v1501_v35  ;;  %v815_v10 = vpop.permute.xlu1 %814  ;;  %v889_v14 = vsel %vm177_vm6, %v2059_v20, %v888_v17  ;;  %1268 = vmatpush1.bf16.msra.mxu0 %v1493_v9 }
 0x375   :  { %v819_v18 = vrot.slane %v815_v10, 4  ;;  %v1495_v44 = vcombine.low %v857_v48, %v889_v14  ;;  %v1496_v60 = vcombine.high %v857_v48, %v889_v14  ;;  %1269 = vmatprep.subr.bf16.mxu0 %v1488_v11 }
 0x377   :  { %v824_v58 = vsel %vm76_vm0, %v818_v24, %v819_v18  ;;  %1308 = vmatprep.subr.bf16.mxu1 %v1496_v60 }
 0x378   :  { %1309 = vmatpush1.bf16.msra.mxu1 %v1495_v44  ;;  %v825_v3 = vsel %vm111_vm8, %v813_v13, %v824_v58  ;;  %1270 = vmatpush1.bf16.msra.mxu0 %v1487_v34 }
 0x379   :  { %v1489_v46 = vcombine.low %v793_v32, %v825_v3  ;;  %v1490_v20 = vcombine.high %v793_v32, %v825_v3 }
 0x37b   :  { %1310 = vmatprep.subr.bf16.mxu1 %v1490_v20  ;;  %1518 = vmatmul.mubr.msk.bf16.vlgmr.msra.gmra.mxu0 %vm490_vm9, %v2101_v8 }
 0x37c   :  { %1311 = vmatpush1.bf16.msra.mxu1 %v1489_v46 }
 0x37f   :  { %1520 = vmatmul.mubr.msk.bf16.vlgmr.msra.gmra.mxu1 %vm490_vm9, %v2101_v8 }
 0x42b   :  { %v1248_v49 = vpop.f32.mrf.mxu1 }
 0x42c   :  { %v1337_v50 = vmul.f32 %v1248_v49, %v1917_v52 }
 0x42d   :  { %v1250_v31 = vpop.f32.mrf.mxu1 }
 0x42e   :  { %v1338_v55 = vmul.f32 %v1250_v31, %v1919_v54  ;;  %v1351_v23 = vmul.f32 %v1337_v50, %v1337_v50 }
 0x42f   :  { %v1252_v19 = vpop.f32.mrf.mxu1 }
 0x430   :  { %v1352_v38 = vmul.f32 %v1338_v55, %v1338_v55  ;;  %v1343_v28 = vadd.f32 %v1338_v55, %v1337_v50 }
 0x431   :  { %v1253_v62 = vpop.f32.mrf.mxu1 }
 0x432   :  { %v1357_v53 = vadd.f32 %v1352_v38, %v1351_v23 }
 0x43b   :  { %v1289_v4 = vpop.f32.mrf.mxu0 }
 0x43c   :  { %v1339_v47 = vmul.f32 %v1289_v4, %v1925_v57 }
 0x43d   :  { %v1291_v33 = vpop.f32.mrf.mxu0 }
 0x43e   :  { %v1344_v21 = vadd.f32 %v1343_v28, %v1339_v47  ;;  %v1353_v0 = vmul.f32 %v1339_v47, %v1339_v47  ;;  %v1340_v8 = vmul.f32 %v1291_v33, %v1927_v59 }
 0x43f   :  { %v1330_v36 = vpop.f32.mrf.mxu1  ;;  %v1293_v37 = vpop.f32.mrf.mxu0 }
 0x440   :  { %v1341_v45 = vmul.f32 %v1330_v36, %v1931_v12  ;;  %v1358_v51 = vadd.f32 %v1357_v53, %v1353_v0  ;;  %v1345_v52 = vadd.f32 %v1344_v21, %v1340_v8  ;;  %v1354_v63 = vmul.f32 %v1340_v8, %v1340_v8 }
 0x441   :  { %v1332_v54 = vpop.f32.mrf.mxu1  ;;  %v1294_v13 = vpop.f32.mrf.mxu0 }
 0x442   :  { %v1355_v39 = vmul.f32 %v1341_v45, %v1341_v45  ;;  %v1342_v29 = vmul.f32 %v1332_v54, %v1933_v16  ;;  %v1346_v57 = vadd.f32 %v1345_v52, %v1341_v45  ;;  %v1359_v15 = vadd.f32 %v1358_v51, %v1354_v63  ;;  %v1368_v16 = vld [vmem:[%s2173_s5] sm:$0xff]  ;;  %s1625_s5 = smov [#allocation9]  }
 0x443   :  { %v1334_v24 = vpop.f32.mrf.mxu1  ;;  %s1436_s6 = sshll.u32 %s1625_s5, 4  ;;  %s1437_s6 = int_to_ptr.vmem [resolvable:$true] %s1436_s6 }
 0x444   :  { %v1356_v40 = vmul.f32 %v1342_v29, %v1342_v29  ;;  %v1347_v41 = vadd.f32 %v1346_v57, %v1342_v29  ;;  %v1360_v30 = vadd.f32 %v1359_v15, %v1355_v39  ;;  %s1588_s2 = scalar_lea.vmem %s1437_s6, 384  ;;  %p1593_p11 = scmp.lt.s32.totalorder %s1437_s6, %s1437_s6 }
 0x445   :  { %v1335_v26 = vpop.f32.mrf.mxu1  ;;  %p1589_p10 = scmp.ne.s32.totalorder %s1437_s6, %s1588_s2  ;;  %p1594_p12 = scmp.lt.s32.totalorder %s1588_s2, %s1588_s2 }
 0x446   :  { %1348 = vadd.xlane.f32.xlu0 %v1347_v41  ;;  %v1361_v59 = vadd.f32 %v1360_v30, %v1356_v40 }
 0x447   :  { %p1595_p13 = por %p1594_p12, %p1593_p11 }
 0x448   :  { %1362 = vadd.xlane.f32.xlu1 %v1361_v59 }
 0x449   :  { %p1596_p0 = pnand %p1595_p13, %p1589_p10 }
 0x4cf   :  { %v1349_v6 = vpop.xlane.xlu0 %1348 }
 0x4d0   :  { %v1350_v12 = vmul.f32 0.001953125, %v1349_v6 }
 0x4d1   :  { %v1363_v27 = vpop.xlane.xlu1 %1362 }
 0x4d2   :  { %v1365_v56 = vmul.f32 %v1350_v12, %v1350_v12  ;;  %v1364_v61 = vmul.f32 0.001953125, %v1363_v27 }
 0x4d4   :  { %v1366_v42 = vsub.f32 %v1364_v61, %v1365_v56 }
 0x4d6   :  { %v1367_v2 = vmax.f32 %v1366_v42, 0.0 }
 0x4d8   :  { %v1369_v7 = vadd.f32 1e-05, %v1367_v2 }
 0x4da   :  { %1546 = vrsqrt.f32 %v1369_v7 }
 0x4e7   :  { %v1547_v1 = vpop.eup %1546 }
 0x4e8   :  { %v1371_v5 = vmul.f32 %v1547_v1, %v1368_v16 }
 0x4ea   :  { %1377 = vperm.xlu0 %1542, %v1371_v5   ;;  %v1373_v35 = vmul.f32 %v1371_v5, %v1350_v12 }
 0x4ec   :  { %v1374_v22 = vsub.f32 %v1372_v25, %v1373_v35 }
 0x4ee   :  { %1388 = vperm.xlu1 %1543, %v1374_v22  }
 0x565   :  { %v1378_v17 = vpop.permute.xlu0 %1377 }
 0x566   :  { %v1380_v9 = vmul.f32 %v1378_v17, %v1248_v49  ;;  %v1381_v48 = vmul.f32 %v1378_v17, %v1250_v31  ;;  %v1382_v10 = vmul.f32 %v1378_v17, %v1289_v4  ;;  %v1383_v11 = vmul.f32 %v1378_v17, %v1291_v33 }
 0x567   :  { %v1384_v14 = vmul.f32 %v1378_v17, %v1330_v36  ;;  %v1385_v43 = vmul.f32 %v1378_v17, %v1332_v54 }
 0x569   :  { %v1389_v18 = vpop.permute.xlu1 %1388 }
 0x56a   :  { %v1391_v44 = vadd.f32 %v1389_v18, %v1380_v9  ;;  %v1392_v60 = vadd.f32 %v1389_v18, %v1381_v48  ;;  %v1393_v58 = vadd.f32 %v1389_v18, %v1382_v10  ;;  %v1394_v34 = vadd.f32 %v1389_v18, %v1383_v11 }
 0x56b   :  { %v1395_v32 = vadd.f32 %v1389_v18, %v1384_v14  ;;  %v1396_v3 = vadd.f32 %v1389_v18, %v1385_v43 }
 0x56c   :  { %v1397_v46 = vmax.f32 %v1391_v44, 0.0  ;;  %v1398_v20 = vmax.f32 %v1392_v60, 0.0  ;;  %v1399_v19 = vmax.f32 %v1393_v58, 0.0  ;;  %v1400_v62 = vmax.f32 %v1394_v34, 0.0 }
 0x56d   :  { %v1401_v50 = vmax.f32 %v1395_v32, 0.0  ;;  %v1402_v49 = vmax.f32 %v1396_v3, 0.0 }
 0x56e   :  { %v1527_v31 = vpack.c.bf16 %v1398_v20, %v1397_v46  ;;  %v1528_v55 = vpack.c.bf16 %v1400_v62, %v1399_v19 }
 0x56f   :  { %v1529_v23 = vpack.c.bf16 %v1402_v49, %v1401_v50 }
 0x570   :  { %1427 = vst [vmem:[#allocation9] sm:$0xff] %v1527_v31  ;;  %1428 = vst [vmem:[#allocation9 + $0x8] sm:$0xff] %v1528_v55 }
 0x571   :  { %1429 = vst [vmem:[#allocation9 + $0x10] sm:$0xff] %v1529_v23 }
 0x572   :  { %1599 = shalt.err (!%p1596_p0)
}
 0x573   :  { %1439 = dma.vmem_to_hbm [thread:$0]  %s1437_s6, 384, %s2176_s8, [#allocation6]  }
 0x574   :  { %1612 = dma.done.wait [#allocation6], 384  }
 0x575   :  { %1613 = vsyncadd [#allocation6], 4294966912 }
 0x576   :  { %1443 = vsyncpa [#allocation5], 1 }
 0x577   :  { %1444 = vsyncpa [#allocation8], 1 }
 0x578   :  { %1445 = vsyncpa [#allocation6], 1 }

</bundles_post_ra>
